<compile_context>
chip_gen: v6e
topology: v6e:2x2x1
jax: 0.10.0
libtpu: 0.0.40
codegen_flags: <defaults>
</compile_context>

<pallas_src>
import functools
import math

import jax
import jax.numpy as jnp
from jax.experimental import pallas as pl
from jax.experimental.pallas import tpu as pltpu  # noqa: F401  (TPU backend)

F32 = jnp.float32


# ----------------------------------------------------------------------------
# In-kernel helpers
# ----------------------------------------------------------------------------
def _apply_act(y, act):
    if act == "leaky_relu":
        return jnp.where(y > 0.0, y, 0.01 * y)
    if act == "tanh":
        return jnp.tanh(y)
    if act == "relu":
        return jnp.maximum(y, 0.0)
    return y  # None / identity


def _layernorm(x, g, b, eps=1e-5):
    mean = jnp.mean(x, axis=-1, keepdims=True)
    var = jnp.mean((x - mean) ** 2, axis=-1, keepdims=True)
    return (x - mean) * jax.lax.rsqrt(var + eps) * g + b


# ----------------------------------------------------------------------------
# Kernel: fused linear (+ optional activation).
# Used for the two im2col convolutions and the return_embedding projection.
# ----------------------------------------------------------------------------
def _linear_kernel(x_ref, w_ref, b_ref, o_ref, *, act):
    y = jnp.dot(x_ref[...], w_ref[...], preferred_element_type=F32) + b_ref[...]
    o_ref[...] = _apply_act(y, act).astype(o_ref.dtype)


def linear_pallas(x, w, b, act=None):
    M, N = x.shape[0], w.shape[1]
    return pl.pallas_call(
        functools.partial(_linear_kernel, act=act),
        out_shape=jax.ShapeDtypeStruct((M, N), F32),
    )(x.astype(F32), w, b.reshape(1, N))


# ----------------------------------------------------------------------------
# Kernel: fused MLP head
#   [optional proj on the state part] -> concat(action embeds) -> fc stack
#   (activation on every layer) -> output projection.  Single pallas_call, so
#   every intermediate stays in VMEM / vregs.
# ----------------------------------------------------------------------------
def _make_head_kernel(has_proj, n_fc, act):
    def kernel(*refs):
        state_ref, act_ref = refs[0], refs[1]
        o_ref = refs[-1]
        idx = 2
        x = state_ref[...]
        if has_proj:
            wp, bp = refs[idx][...], refs[idx + 1][...]
            idx += 2
            x = jnp.dot(x, wp, preferred_element_type=F32) + bp
        x = jnp.concatenate([x, act_ref[...]], axis=-1)
        for _ in range(n_fc):
            w, b = refs[idx][...], refs[idx + 1][...]
            idx += 2
            x = _apply_act(jnp.dot(x, w, preferred_element_type=F32) + b, act)
        w, b = refs[idx][...], refs[idx + 1][...]
        o_ref[...] = (jnp.dot(x, w, preferred_element_type=F32) + b).astype(o_ref.dtype)
    return kernel


def mlp_head_pallas(state, act_e, proj, fc, out, act):
    """state:(B,Ds) act_e:(B,Da); proj: optional (w,b); fc: [(w,b)]; out:(w,b)."""
    B = state.shape[0]
    n_out = out[0].shape[1]
    args = [state.astype(F32), act_e.astype(F32)]
    if proj is not None:
        args += [proj[0], proj[1].reshape(1, -1)]
    for (w, b) in fc:
        args += [w, b.reshape(1, -1)]
    args += [out[0], out[1].reshape(1, -1)]
    return pl.pallas_call(
        _make_head_kernel(proj is not None, len(fc), act),
        out_shape=jax.ShapeDtypeStruct((B, n_out), F32),
    )(*args)


# ----------------------------------------------------------------------------
# Kernel: fused multi-layer single-step LSTM + output projection.
# With seq_len == 1 and h0 = c0 = 0 the recurrent weights W_hh and the forget
# gate never contribute, so per layer only a (in, 3H) matmul (i, g, o gates)
# is needed.
# ----------------------------------------------------------------------------
def _make_lstm_kernel(n_layers, hidden):
    def kernel(*refs):
        state_ref, act_ref = refs[0], refs[1]
        o_ref = refs[-1]
        x = jnp.concatenate([state_ref[...], act_ref[...]], axis=-1)
        idx = 2
        for _ in range(n_layers):
            w, b = refs[idx][...], refs[idx + 1][...]
            idx += 2
            g = jnp.dot(x, w, preferred_element_type=F32) + b      # (B, 3H): i, g, o
            i_g = jax.nn.sigmoid(g[:, :hidden])
            g_g = jnp.tanh(g[:, hidden:2 * hidden])
            o_g = jax.nn.sigmoid(g[:, 2 * hidden:])
            c = i_g * g_g                                          # c_prev == 0
            x = o_g * jnp.tanh(c)
        w, b = refs[idx][...], refs[idx + 1][...]
        o_ref[...] = (jnp.dot(x, w, preferred_element_type=F32) + b).astype(o_ref.dtype)
    return kernel


def lstm_head_pallas(state, act_e, layers, out, hidden):
    B = state.shape[0]
    n_out = out[0].shape[1]
    args = [state.astype(F32), act_e.astype(F32)]
    for (w, b) in layers:
        args += [w, b.reshape(1, -1)]
    args += [out[0], out[1].reshape(1, -1)]
    return pl.pallas_call(
        _make_lstm_kernel(len(layers), hidden),
        out_shape=jax.ShapeDtypeStruct((B, n_out), F32),
    )(*args)


# ----------------------------------------------------------------------------
# Kernel: fully fused TransformerEncoder
#   token embedding + L x (fused-QKV attention, post-norm, relu FFN) + output
#   projection in a single pallas_call.  Per-layer weights are passed stacked
#   along a leading L axis and indexed statically inside the kernel.
# ----------------------------------------------------------------------------
def _make_transformer_kernel(B, S_real, S_pad, H, n_heads, n_layers):
    dh = H // n_heads
    scale = 1.0 / math.sqrt(dh)

    def kernel(tok_ref, w_emb_ref, b_emb_ref,
               w_qkv_ref, b_qkv_ref, w_o_ref, b_o_ref,
               w_ff1_ref, b_ff1_ref, w_ff2_ref, b_ff2_ref,
               ln1_g_ref, ln1_b_ref, ln2_g_ref, ln2_b_ref,
               w_out_ref, b_out_ref, o_ref):
        # Token embedding: one block-weight matmul covers both input_proj
        # ([state | 0] rows) and action_proj ([0 | action] rows); the
        # per-token-type bias slab is prebuilt by the wrapper.
        x = jnp.dot(tok_ref[...], w_emb_ref[...],
                    preferred_element_type=F32) + b_emb_ref[...]   # (B*S_pad, H)

        # Mask for the padded (dummy) key positions, built once.
        key_ids = jax.lax.broadcasted_iota(jnp.int32, (1, 1, S_pad), 2)
        kmask = jnp.where(key_ids < S_real, 0.0, -1e9).astype(F32)

        for l in range(n_layers):
            qkv = jnp.dot(x, w_qkv_ref[l], preferred_element_type=F32) + b_qkv_ref[l]
            heads = []
            for h in range(n_heads):
                qh = qkv[:, h * dh:(h + 1) * dh].reshape(B, S_pad, dh)
                kh = qkv[:, H + h * dh:H + (h + 1) * dh].reshape(B, S_pad, dh)
                vh = qkv[:, 2 * H + h * dh:2 * H + (h + 1) * dh].reshape(B, S_pad, dh)
                s = jnp.einsum("bsd,btd->bst", qh, kh,
                               preferred_element_type=F32) * scale + kmask
                s = s - jnp.max(s, axis=-1, keepdims=True)
                p = jnp.exp(s)
                p = p * pl.reciprocal(jnp.sum(p, axis=-1, keepdims=True), approx=True)
                oh = jnp.einsum("bst,btd->bsd", p, vh, preferred_element_type=F32)
                heads.append(oh.reshape(B * S_pad, dh))
            attn = jnp.concatenate(heads, axis=-1)                 # (B*S_pad, H)
            attn = jnp.dot(attn, w_o_ref[l], preferred_element_type=F32) + b_o_ref[l]
            # Post-norm TransformerEncoderLayer (PyTorch default), eval mode.
            x = _layernorm(x + attn, ln1_g_ref[l], ln1_b_ref[l])
            ff = jnp.maximum(jnp.dot(x, w_ff1_ref[l], preferred_element_type=F32)
                             + b_ff1_ref[l], 0.0)
            ff = jnp.dot(ff, w_ff2_ref[l], preferred_element_type=F32) + b_ff2_ref[l]
            x = _layernorm(x + ff, ln2_g_ref[l], ln2_b_ref[l])

        final = x.reshape(B, S_pad, H)[:, 0, :]                    # state-token output
        o_ref[...] = (jnp.dot(final, w_out_ref[...], preferred_element_type=F32)
                      + b_out_ref[...]).astype(o_ref.dtype)

    return kernel


# ----------------------------------------------------------------------------
# Deterministic synthetic parameter init + wrapper-side im2col
# ----------------------------------------------------------------------------
def _dense(key, in_dim, out_dim, scale=0.05):
    kw, kb = jax.random.split(key)
    w = jax.random.normal(kw, (in_dim, out_dim), F32) * scale
    b = jax.random.normal(kb, (out_dim,), F32) * scale
    return w, b


def _im2col_3x3(x_nhwc):
    """3x3 / stride 1 / pad 1 patch matrix: (B*H*W, 9*C), feature order (dy, dx, c)."""
    B, H, W, C = x_nhwc.shape
    xp = jnp.pad(x_nhwc, ((0, 0), (1, 1), (1, 1), (0, 0)))
    cols = [xp[:, dy:dy + H, dx:dx + W, :].reshape(B * H * W, C)
            for dy in range(3) for dx in range(3)]
    return jnp.concatenate(cols, axis=-1)


# ----------------------------------------------------------------------------
# Predictors
# ----------------------------------------------------------------------------
class GridPredictorPallas:
    def __init__(self, key, input_dim, output_dim, num_actions=6, action_embed_dim=4,
                 hidden_size=128, num_layers=2, dropout=0.1, activation="relu",
                 channels=None, height=None, width=None, is_reward=False):
        ks = iter(jax.random.split(key, 16))
        self.activation = activation if activation in ("relu", "leaky_relu", "tanh") else "relu"
        self.is_reward = is_reward
        self.action_embedding = jax.random.normal(
            next(ks), (num_actions, action_embed_dim), F32) * 0.1
        self.is_grid_input = channels is not None and height is not None and width is not None
        if self.is_grid_input:
            self.channels, self.height, self.width = channels, height, width
            # im2col conv weights (rows ordered (dy, dx, cin)).  Synthetic weights:
            # equivalent to torch's OIHW Conv2d weights up to a fixed permutation.
            k1, k2 = jax.random.split(next(ks))
            self.conv1_w = jax.random.normal(k1, (9 * channels, 32), F32) * 0.05
            self.conv1_b = jax.random.normal(k2, (32,), F32) * 0.05
            k1, k2 = jax.random.split(next(ks))
            self.conv2_w = jax.random.normal(k1, (9 * 32, 64), F32) * 0.05
            self.conv2_b = jax.random.normal(k2, (64,), F32) * 0.05
            # proj over the NHWC-flattened conv output (synthetic weights: equal to
            # torch's NCHW flatten up to a permutation of proj's input rows).
            self.proj = _dense(next(ks), 64 * height * width, input_dim)
        total_input_dim = input_dim + 2 * action_embed_dim
        self.fc = [_dense(next(ks), total_input_dim, hidden_size)]
        for _ in range(num_layers - 1):
            self.fc.append(_dense(next(ks), hidden_size, hidden_size))
        out_dim = 1 if is_reward else output_dim
        self.output_proj = _dense(next(ks), hidden_size, out_dim)

    def _encode_grid(self, state):
        batch = state.shape[0]
        x = jnp.transpose(state, (0, 2, 3, 1)).astype(F32)         # NCHW -> NHWC
        y1 = linear_pallas(_im2col_3x3(x), self.conv1_w, self.conv1_b,
                           act=self.activation)                     # (B*H*W, 32)
        y1 = y1.reshape(batch, self.height, self.width, 32)
        y2 = linear_pallas(_im2col_3x3(y1), self.conv2_w, self.conv2_b,
                           act=self.activation)                     # (B*H*W, 64)
        return y2.reshape(batch, self.height * self.width * 64)

    def __call__(self, state, action_indices, return_embedding=False):
        batch = state.shape[0]
        if self.is_grid_input:
            conv_flat = self._encode_grid(state)
            if return_embedding:
                return linear_pallas(conv_flat, *self.proj)
            act_e = jnp.take(self.action_embedding, action_indices, axis=0).reshape(batch, -1)
            return mlp_head_pallas(conv_flat, act_e, self.proj, self.fc,
                                   self.output_proj, self.activation)
        state_embed = state.astype(F32)
        if return_embedding:
            return state_embed
        act_e = jnp.take(self.action_embedding, action_indices, axis=0).reshape(batch, -1)
        return mlp_head_pallas(state_embed, act_e, None, self.fc,
                               self.output_proj, self.activation)


class LSTMPredictorPallas:
    def __init__(self, key, input_dim, output_dim, num_actions=6, action_embed_dim=4,
                 hidden_size=128, num_layers=2, dropout=0.1, bidirectional=False,
                 is_reward=False):
        # TODO(synk): bidirectional LSTM path not implemented (forward-only).
        assert not bidirectional
        ks = iter(jax.random.split(key, 4 + num_layers))
        self.hidden_size = hidden_size
        self.is_reward = is_reward
        self.action_embedding = jax.random.normal(
            next(ks), (num_actions, action_embed_dim), F32) * 0.1
        in_dim = input_dim + 2 * action_embed_dim
        self.layers = []
        for _ in range(num_layers):
            k1, k2 = jax.random.split(next(ks))
            # Synthetic weights for the live gates only (i, g, o): with a single
            # step and c0 = 0, PyTorch's forget gate and W_hh never contribute.
            # The bias plays the role of the combined b_ih + b_hh.
            w = jax.random.normal(k1, (in_dim, 3 * hidden_size), F32) * 0.05
            b = jax.random.normal(k2, (3 * hidden_size,), F32) * 0.05
            self.layers.append((w, b))
            in_dim = hidden_size
        out_dim = 1 if is_reward else output_dim
        self.output_proj = _dense(next(ks), hidden_size, out_dim)

    def __call__(self, state, action_indices, return_embedding=False):
        if return_embedding:
            return state
        batch = state.shape[0]
        act_e = jnp.take(self.action_embedding, action_indices, axis=0).reshape(batch, -1)
        return lstm_head_pallas(state.astype(F32), act_e, self.layers,
                                self.output_proj, self.hidden_size)


class TransformerPredictorPallas:
    def __init__(self, key, input_dim, output_dim, num_actions=6, action_embed_dim=4,
                 hidden_size=128, num_layers=2, num_heads=4, dropout=0.1,
                 is_reward=False, teacher_forcing_ratio=0.5):
        ks = iter(jax.random.split(key, 8 + 8 * num_layers))
        self.input_dim = input_dim
        self.output_dim = output_dim
        self.action_embed_dim = action_embed_dim
        self.hidden_size = hidden_size
        self.num_heads = num_heads
        self.num_layers = num_layers
        self.is_reward = is_reward
        H = hidden_size
        self.action_embedding = jax.random.normal(
            next(ks), (num_actions, action_embed_dim), F32) * 0.1
        w_in, self.b_in = _dense(next(ks), input_dim, H)
        w_act, self.b_act = _dense(next(ks), action_embed_dim, H)
        # Block weight: a single matmul embeds both token types ([state|0], [0|act]).
        self.w_emb = jnp.concatenate([w_in, w_act], axis=0)         # (Din + A, H)

        wqkv, bqkv, wo_l, bo_l, f1, g1, f2, g2 = [], [], [], [], [], [], [], []
        l1g, l1b, l2g, l2b = [], [], [], []
        for _ in range(num_layers):
            wq, bq = _dense(next(ks), H, H)
            wk, bk = _dense(next(ks), H, H)
            wv, bv = _dense(next(ks), H, H)
            wqkv.append(jnp.concatenate([wq, wk, wv], axis=1))      # fused QKV (H, 3H)
            bqkv.append(jnp.concatenate([bq, bk, bv]).reshape(1, 3 * H))
            wo, bo = _dense(next(ks), H, H)
            wo_l.append(wo); bo_l.append(bo.reshape(1, H))
            w1, b1 = _dense(next(ks), H, 4 * H)
            w2, b2 = _dense(next(ks), 4 * H, H)
            f1.append(w1); g1.append(b1.reshape(1, 4 * H))
            f2.append(w2); g2.append(b2.reshape(1, H))
            l1g.append(jnp.ones((1, H), F32)); l1b.append(jnp.zeros((1, H), F32))
            l2g.append(jnp.ones((1, H), F32)); l2b.append(jnp.zeros((1, H), F32))
        self.w_qkv = jnp.stack(wqkv); self.b_qkv = jnp.stack(bqkv)
        self.w_o = jnp.stack(wo_l); self.b_o = jnp.stack(bo_l)
        self.w_ff1 = jnp.stack(f1); self.b_ff1 = jnp.stack(g1)
        self.w_ff2 = jnp.stack(f2); self.b_ff2 = jnp.stack(g2)
        self.ln1_g = jnp.stack(l1g); self.ln1_b = jnp.stack(l1b)
        self.ln2_g = jnp.stack(l2g); self.ln2_b = jnp.stack(l2b)
        out_dim = 1 if is_reward else output_dim
        self.output_proj = _dense(next(ks), H, out_dim)

    def __call__(self, state, action_indices, return_embedding=False,
                 target_state=None, use_teacher_forcing=None):
        # TODO(synk): teacher-forcing branch needs training-mode RNG (torch.rand);
        # the eval path (no teacher forcing) is implemented.
        batch = state.shape[0]
        is_grid_input = state.ndim > 2
        original_shape = state.shape
        if is_grid_input:
            state = state.reshape(batch, -1)
        state = state.astype(F32)
        H, A, Din = self.hidden_size, self.action_embed_dim, self.input_dim
        NA = action_indices.shape[1]
        S = 1 + NA
        # Pad the sequence to a multiple of 8 tokens so all in-kernel reshapes are
        # sublane-aligned; padded key positions are masked inside the kernel.
        S_pad = -(-S // 8) * 8
        act_e = jnp.take(self.action_embedding, action_indices, axis=0)   # (B, NA, A)
        state_tok = jnp.concatenate([state, jnp.zeros((batch, A), F32)], axis=-1)[:, None, :]
        act_tok = jnp.concatenate([jnp.zeros((batch, NA, Din), F32), act_e], axis=-1)
        pad_tok = jnp.zeros((batch, S_pad - S, Din + A), F32)
        tokens = jnp.concatenate([state_tok, act_tok, pad_tok], axis=1)
        tokens = tokens.reshape(batch * S_pad, Din + A)
        bias_block = jnp.concatenate(
            [self.b_in[None, :], jnp.tile(self.b_act[None, :], (S_pad - 1, 1))], axis=0)
        bias_slab = jnp.tile(bias_block[None], (batch, 1, 1)).reshape(batch * S_pad, H)

        out_dim = self.output_proj[0].shape[1]
        kern = _make_transformer_kernel(batch, S, S_pad, H, self.num_heads, self.num_layers)
        out = pl.pallas_call(
            kern, out_shape=jax.ShapeDtypeStruct((batch, out_dim), F32),
        )(tokens, self.w_emb, bias_slab,
          self.w_qkv, self.b_qkv, self.w_o, self.b_o,
          self.w_ff1, self.b_ff1, self.w_ff2, self.b_ff2,
          self.ln1_g, self.ln1_b, self.ln2_g, self.ln2_b,
          self.output_proj[0], self.output_proj[1].reshape(1, -1))

        if self.is_reward or return_embedding:
            return out
        if is_grid_input:
            # NOTE: mirrors the PyTorch code; assumes output_dim == prod(grid dims).
            out = out.reshape(batch, *original_shape[1:])
        return out


class BasePredictorPallas:
    """Pallas equivalent of BasePredictor: abstract forward + factory."""

    @staticmethod
    def create(predictor_type, key, **kwargs):
        t = predictor_type.lower()
        if t == "grid":
            return GridPredictorPallas(key, **kwargs)
        if t == "transformer":
            return TransformerPredictorPallas(key, **kwargs)
        if t == "lstm":
            return LSTMPredictorPallas(key, **kwargs)
        raise ValueError(f"Unknown predictor type: {predictor_type}")


# ----------------------------------------------------------------------------
# Demo
# ----------------------------------------------------------------------------
if __name__ == "__main__":
    key = jax.random.PRNGKey(0)
    k_grid, k_lstm, k_tf, k_state, k_act, k_vec = jax.random.split(key, 6)

    B, C, Hh, Ww = 2, 4, 8, 8
    input_dim, output_dim, hidden = 32, 32, 32

    state_grid = jax.random.normal(k_state, (B, C, Hh, Ww), F32)   # NCHW input
    state_vec = jax.random.normal(k_vec, (B, input_dim), F32)
    action_indices = jax.random.randint(k_act, (B, 2), 0, 6, jnp.int32)

    grid_pred = BasePredictorPallas.create(
        "grid", k_grid, input_dim=input_dim, output_dim=output_dim,
        num_actions=6, action_embed_dim=4, hidden_size=hidden, num_layers=2,
        channels=C, height=Hh, width=Ww)
    lstm_pred = BasePredictorPallas.create(
        "lstm", k_lstm, input_dim=input_dim, output_dim=output_dim,
        num_actions=6, action_embed_dim=4, hidden_size=hidden, num_layers=2)
    tf_pred = BasePredictorPallas.create(
        "transformer", k_tf, input_dim=input_dim, output_dim=output_dim,
        num_actions=6, action_embed_dim=4, hidden_size=hidden,
        num_layers=2, num_heads=4)

    # jit the wrappers so the tiny host-side marshalling (im2col, gathers,
    # reshapes) around the fused Pallas kernels is dispatched once.
    grid_fn = jax.jit(lambda s, a: grid_pred(s, a))
    lstm_fn = jax.jit(lambda s, a: lstm_pred(s, a))
    tf_fn = jax.jit(lambda s, a: tf_pred(s, a))

    out_grid = grid_fn(state_grid, action_indices)
    out_lstm = lstm_fn(state_vec, action_indices)
    out_tf = tf_fn(state_vec, action_indices)

    jax.block_until_ready((out_grid, out_lstm, out_tf))
    assert out_grid.shape == (B, output_dim)
    assert out_lstm.shape == (B, output_dim)
    assert out_tf.shape == (B, output_dim)
    assert all(bool(jnp.all(jnp.isfinite(o))) for o in (out_grid, out_lstm, out_tf))
    print("KERNEL_OK")
</pallas_src>

<mosaic_0001>
module attributes {stable_mosaic.version = 11 : i64} {
  func.func @_linear_kernel(%arg0: memref<128x36xf32, #tpu.memory_space<vmem>>, %arg1: memref<36x32xf32, #tpu.memory_space<vmem>>, %arg2: memref<1x32xf32, #tpu.memory_space<vmem>>, %arg3: memref<128x32xf32, #tpu.memory_space<vmem>>) attributes {dimension_semantics = [], scalar_prefetch = 0 : i64, scratch_operands = 0 : i64, tpu.core_type = #tpu.core_type<tc>} {
    %c0 = arith.constant 0 : index
    %c0_0 = arith.constant 0 : index
    %0 = vector.load %arg0[%c0, %c0_0] : memref<128x36xf32, #tpu.memory_space<vmem>>, vector<128x36xf32>
    %c0_1 = arith.constant 0 : index
    %c0_2 = arith.constant 0 : index
    %1 = vector.load %arg1[%c0_1, %c0_2] : memref<36x32xf32, #tpu.memory_space<vmem>>, vector<36x32xf32>
    %cst = arith.constant dense<0.000000e+00> : vector<128x32xf32>
    %2 = tpu.matmul %0, %1, %cst {dimension_numbers = #tpu.dot_dimension_numbers<[1], [0], [0], [1], [0, 0, 1, 1], [], []>} : vector<128x36xf32>, vector<36x32xf32>, vector<128x32xf32> -> vector<128x32xf32>
    %c0_3 = arith.constant 0 : index
    %c0_4 = arith.constant 0 : index
    %3 = vector.load %arg2[%c0_3, %c0_4] : memref<1x32xf32, #tpu.memory_space<vmem>>, vector<1x32xf32>
    %4 = vector.broadcast %3 : vector<1x32xf32> to vector<128x32xf32>
    %5 = arith.addf %2, %4 : vector<128x32xf32>
    %cst_5 = arith.constant 0.000000e+00 : f32
    %6 = vector.broadcast %cst_5 : f32 to vector<128x32xf32>
    %7 = arith.maximumf %5, %6 : vector<128x32xf32>
    %c0_6 = arith.constant 0 : index
    %c0_7 = arith.constant 0 : index
    %8 = vector.load %arg3[%c0_6, %c0_7] : memref<128x32xf32, #tpu.memory_space<vmem>>, vector<128x32xf32>
    tpu.vector_store %arg3[%c0_6, %c0_7], %7 {strides = array<i32>} : memref<128x32xf32, #tpu.memory_space<vmem>>, vector<128x32xf32>,
    return
  }
}

module attributes {stable_mosaic.version = 11 : i64} {
  func.func @_linear_kernel(%arg0: memref<128x288xf32, #tpu.memory_space<vmem>>, %arg1: memref<288x64xf32, #tpu.memory_space<vmem>>, %arg2: memref<1x64xf32, #tpu.memory_space<vmem>>, %arg3: memref<128x64xf32, #tpu.memory_space<vmem>>) attributes {dimension_semantics = [], scalar_prefetch = 0 : i64, scratch_operands = 0 : i64, tpu.core_type = #tpu.core_type<tc>} {
    %c0 = arith.constant 0 : index
    %c0_0 = arith.constant 0 : index
    %0 = vector.load %arg0[%c0, %c0_0] : memref<128x288xf32, #tpu.memory_space<vmem>>, vector<128x288xf32>
    %c0_1 = arith.constant 0 : index
    %c0_2 = arith.constant 0 : index
    %1 = vector.load %arg1[%c0_1, %c0_2] : memref<288x64xf32, #tpu.memory_space<vmem>>, vector<288x64xf32>
    %cst = arith.constant dense<0.000000e+00> : vector<128x64xf32>
    %2 = tpu.matmul %0, %1, %cst {dimension_numbers = #tpu.dot_dimension_numbers<[1], [0], [0], [1], [0, 0, 1, 1], [], []>} : vector<128x288xf32>, vector<288x64xf32>, vector<128x64xf32> -> vector<128x64xf32>
    %c0_3 = arith.constant 0 : index
    %c0_4 = arith.constant 0 : index
    %3 = vector.load %arg2[%c0_3, %c0_4] : memref<1x64xf32, #tpu.memory_space<vmem>>, vector<1x64xf32>
    %4 = vector.broadcast %3 : vector<1x64xf32> to vector<128x64xf32>
    %5 = arith.addf %2, %4 : vector<128x64xf32>
    %cst_5 = arith.constant 0.000000e+00 : f32
    %6 = vector.broadcast %cst_5 : f32 to vector<128x64xf32>
    %7 = arith.maximumf %5, %6 : vector<128x64xf32>
    %c0_6 = arith.constant 0 : index
    %c0_7 = arith.constant 0 : index
    %8 = vector.load %arg3[%c0_6, %c0_7] : memref<128x64xf32, #tpu.memory_space<vmem>>, vector<128x64xf32>
    tpu.vector_store %arg3[%c0_6, %c0_7], %7 {strides = array<i32>} : memref<128x64xf32, #tpu.memory_space<vmem>>, vector<128x64xf32>,
    return
  }
}

module attributes {stable_mosaic.version = 11 : i64} {
  func.func @kernel(%arg0: memref<2x4096xf32, #tpu.memory_space<vmem>>, %arg1: memref<2x8xf32, #tpu.memory_space<vmem>>, %arg2: memref<4096x32xf32, #tpu.memory_space<vmem>>, %arg3: memref<1x32xf32, #tpu.memory_space<vmem>>, %arg4: memref<40x32xf32, #tpu.memory_space<vmem>>, %arg5: memref<1x32xf32, #tpu.memory_space<vmem>>, %arg6: memref<32x32xf32, #tpu.memory_space<vmem>>, %arg7: memref<1x32xf32, #tpu.memory_space<vmem>>, %arg8: memref<32x32xf32, #tpu.memory_space<vmem>>, %arg9: memref<1x32xf32, #tpu.memory_space<vmem>>, %arg10: memref<2x32xf32, #tpu.memory_space<vmem>>) attributes {dimension_semantics = [], scalar_prefetch = 0 : i64, scratch_operands = 0 : i64, tpu.core_type = #tpu.core_type<tc>} {
    %c0 = arith.constant 0 : index
    %c0_0 = arith.constant 0 : index
    %0 = vector.load %arg0[%c0, %c0_0] : memref<2x4096xf32, #tpu.memory_space<vmem>>, vector<2x4096xf32>
    %c0_1 = arith.constant 0 : index
    %c0_2 = arith.constant 0 : index
    %1 = vector.load %arg2[%c0_1, %c0_2] : memref<4096x32xf32, #tpu.memory_space<vmem>>, vector<4096x32xf32>
    %c0_3 = arith.constant 0 : index
    %c0_4 = arith.constant 0 : index
    %2 = vector.load %arg3[%c0_3, %c0_4] : memref<1x32xf32, #tpu.memory_space<vmem>>, vector<1x32xf32>
    %cst = arith.constant dense<0.000000e+00> : vector<2x32xf32>
    %3 = tpu.matmul %0, %1, %cst {dimension_numbers = #tpu.dot_dimension_numbers<[1], [0], [0], [1], [0, 0, 1, 1], [], []>} : vector<2x4096xf32>, vector<4096x32xf32>, vector<2x32xf32> -> vector<2x32xf32>
    %4 = vector.broadcast %2 : vector<1x32xf32> to vector<2x32xf32>
    %5 = arith.addf %3, %4 : vector<2x32xf32>
    %c0_5 = arith.constant 0 : index
    %c0_6 = arith.constant 0 : index
    %6 = vector.load %arg1[%c0_5, %c0_6] : memref<2x8xf32, #tpu.memory_space<vmem>>, vector<2x8xf32>
    %7 = tpu.concatenate %5, %6 in 1 : vector<2x32xf32>, vector<2x8xf32> -> vector<2x40xf32>
    %c0_7 = arith.constant 0 : index
    %c0_8 = arith.constant 0 : index
    %8 = vector.load %arg4[%c0_7, %c0_8] : memref<40x32xf32, #tpu.memory_space<vmem>>, vector<40x32xf32>
    %c0_9 = arith.constant 0 : index
    %c0_10 = arith.constant 0 : index
    %9 = vector.load %arg5[%c0_9, %c0_10] : memref<1x32xf32, #tpu.memory_space<vmem>>, vector<1x32xf32>
    %cst_11 = arith.constant dense<0.000000e+00> : vector<2x32xf32>
    %10 = tpu.matmul %7, %8, %cst_11 {dimension_numbers = #tpu.dot_dimension_numbers<[1], [0], [0], [1], [0, 0, 1, 1], [], []>} : vector<2x40xf32>, vector<40x32xf32>, vector<2x32xf32> -> vector<2x32xf32>
    %11 = vector.broadcast %9 : vector<1x32xf32> to vector<2x32xf32>
    %12 = arith.addf %10, %11 : vector<2x32xf32>
    %cst_12 = arith.constant 0.000000e+00 : f32
    %13 = vector.broadcast %cst_12 : f32 to vector<2x32xf32>
    %14 = arith.maximumf %12, %13 : vector<2x32xf32>
    %c0_13 = arith.constant 0 : index
    %c0_14 = arith.constant 0 : index
    %15 = vector.load %arg6[%c0_13, %c0_14] : memref<32x32xf32, #tpu.memory_space<vmem>>, vector<32x32xf32>
    %c0_15 = arith.constant 0 : index
    %c0_16 = arith.constant 0 : index
    %16 = vector.load %arg7[%c0_15, %c0_16] : memref<1x32xf32, #tpu.memory_space<vmem>>, vector<1x32xf32>
    %cst_17 = arith.constant dense<0.000000e+00> : vector<2x32xf32>
    %17 = tpu.matmul %14, %15, %cst_17 {dimension_numbers = #tpu.dot_dimension_numbers<[1], [0], [0], [1], [0, 0, 1, 1], [], []>} : vector<2x32xf32>, vector<32x32xf32>, vector<2x32xf32> -> vector<2x32xf32>
    %18 = vector.broadcast %16 : vector<1x32xf32> to vector<2x32xf32>
    %19 = arith.addf %17, %18 : vector<2x32xf32>
    %cst_18 = arith.constant 0.000000e+00 : f32
    %20 = vector.broadcast %cst_18 : f32 to vector<2x32xf32>
    %21 = arith.maximumf %19, %20 : vector<2x32xf32>
    %c0_19 = arith.constant 0 : index
    %c0_20 = arith.constant 0 : index
    %22 = vector.load %arg8[%c0_19, %c0_20] : memref<32x32xf32, #tpu.memory_space<vmem>>, vector<32x32xf32>
    %c0_21 = arith.constant 0 : index
    %c0_22 = arith.constant 0 : index
    %23 = vector.load %arg9[%c0_21, %c0_22] : memref<1x32xf32, #tpu.memory_space<vmem>>, vector<1x32xf32>
    %cst_23 = arith.constant dense<0.000000e+00> : vector<2x32xf32>
    %24 = tpu.matmul %21, %22, %cst_23 {dimension_numbers = #tpu.dot_dimension_numbers<[1], [0], [0], [1], [0, 0, 1, 1], [], []>} : vector<2x32xf32>, vector<32x32xf32>, vector<2x32xf32> -> vector<2x32xf32>
    %25 = vector.broadcast %23 : vector<1x32xf32> to vector<2x32xf32>
    %26 = arith.addf %24, %25 : vector<2x32xf32>
    %c0_24 = arith.constant 0 : index
    %c0_25 = arith.constant 0 : index
    %27 = vector.load %arg10[%c0_24, %c0_25] : memref<2x32xf32, #tpu.memory_space<vmem>>, vector<2x32xf32>
    tpu.vector_store %arg10[%c0_24, %c0_25], %26 {strides = array<i32>} : memref<2x32xf32, #tpu.memory_space<vmem>>, vector<2x32xf32>,
    return
  }
}

</mosaic_0001>

<bundles_post_ra>
// kernel: _lambda_.3
= control target key start
LH: loop header
LB: loop body
LE: loop exit
PB: predicated region body
PF: predicated region fallthrough
CT: control target
= control target key end

     0   :  { %8 = vsyncpa [#allocation3], 0  ;;  %s594_s0 = inlined_call_operand.vmem [shape: f32[128,36], index: 0, kind: input, shape index: {}]   ;;  %s595_s1 = inlined_call_operand.hbm [shape: f32[36,32], index: 1, kind: input, shape index: {}]   ;;  %s596_s2 = inlined_call_operand.hbm [shape: f32[1,32], index: 2, kind: input, shape index: {}]   ;;  %s597_s3 = inlined_call_operand.vmem [shape: f32[128,32], index: 3, kind: output, shape index: {}]  }
   0x1   :  { %9 = vsyncpa [#allocation5], 0  ;;  %s436_s12 = smov [#allocation2]  }
   0x2   :  { %s17_s13 = sshll.u32 %s436_s12, 4  ;;  %s18_s13 = int_to_ptr.vmem [resolvable:$true] %s17_s13 }
   0x3   :  { %s400_s14 = scalar_lea.vmem %s18_s13, 640  ;;  %p405_p1 = scmp.lt.s32.totalorder %s18_s13, %s18_s13 }
   0x4   :  { %p401_p0 = scmp.ne.s32.totalorder %s18_s13, %s400_s14  ;;  %p406_p2 = scmp.lt.s32.totalorder %s400_s14, %s400_s14 }
   0x6   :  { %p407_p3 = por %p406_p2, %p405_p1 }
   0x8   :  { %p408_p4 = pnand %p407_p3, %p401_p0 }
   0xa   :  { %411 = shalt.err (!%p408_p4)
}
   0xb   :  { %s437_s15 = smov 128   ;;  %s438_s16 = smov 8  }
   0xc   :  { %23 = dma.hbm_to_vmem [thread:$0]  %s595_s1, 640, %s18_s13, [#allocation3], %s437_s15, %s437_s15, %s438_s16  }
   0xd   :  { %s439_s19 = smov [#allocation4]  }
   0xe   :  { %s30_s20 = sshll.u32 %s439_s19, 4  ;;  %s31_s20 = int_to_ptr.vmem [resolvable:$true] %s30_s20 }
   0xf   :  { %s420_s21 = scalar_lea.vmem %s31_s20, 16  ;;  %s424_s22 = scalar_lea.vmem %s31_s20, 32 }
  0x10   :  { %p421_p5 = scmp.ne.s32.totalorder %s31_s20, %s420_s21  ;;  %p425_p6 = scmp.lt.s32.totalorder %s31_s20, %s31_s20 }
  0x11   :  { %p426_p7 = scmp.lt.s32.totalorder %s424_s22, %s420_s21 }
  0x13   :  { %p427_p8 = por %p426_p7, %p425_p6 }
  0x15   :  { %p428_p9 = pnand %p427_p8, %p421_p5 }
  0x17   :  { %431 = shalt.err (!%p428_p9)
}
  0x18   :  { %33 = dma.hbm_to_vmem [thread:$0]  %s596_s2, 16, %s31_s20, [#allocation5]  }
  0x19   :  { %432 = dma.done.wait [#allocation3], 640  }
  0x1a   :  { %433 = vsyncadd [#allocation3], 4294966656 }
  0x1b   :  { %434 = dma.done.wait [#allocation5], 16  }
  0x1c   :  { %435 = vsyncadd [#allocation5], 4294967280  ;;  %vm117_vm0 = vcmask 1043456   ;;  %v60_v0 = vld [vmem:[#allocation2 + $0x20] sm:$0xf]  ;;  %v59_v1 = vld [vmem:[#allocation2 + $0x18] sm:$0xff] }
  0x1d   :  { %344 = vmatprep.subr.msk.mxu0 %vm117_vm0, %v60_v0  ;;  %378 = vmatprep.subr.msk.mxu1 %vm117_vm0, %v60_v0  ;;  %v58_v2 = vld [vmem:[#allocation2 + $0x10] sm:$0xff]  ;;  %v57_v3 = vld [vmem:[#allocation2 + $0x8] sm:$0xff]  ;;  %v56_v4 = vld [vmem:[#allocation2] sm:$0xff]  ;;  %vm68_vm1 = vcmask 293888   ;;  %vm282_vm2 = vcmask 261120  }
  0x1e   :  { %345 = vmatpush3.msk.msra.mxu0 %vm117_vm0, %v60_v0  ;;  %383 = vmatpush3.msk.msra.mxu1 %vm117_vm0, %v60_v0  ;;  %v40_v5 = vld [vmem:[%s594_s0] sm:$0xff]  ;;  %v41_v7 = vld [vmem:[%s594_s0 + $0x8] sm:$0xff]  ;;  %v42_v9 = vld [vmem:[%s594_s0 + $0x10] sm:$0xff] }
  0x1f   :  { %346 = vmatprep.subr.mxu0 %v59_v1  ;;  %379 = vmatprep.subr.mxu1 %v59_v1  ;;  %v48_v6 = vld [vmem:[%s594_s0 + $0x40] sm:$0xff]  ;;  %v49_v8 = vld [vmem:[%s594_s0 + $0x48] sm:$0xff]  ;;  %v50_v10 = vld [vmem:[%s594_s0 + $0x50] sm:$0xff] }
  0x20   :  { %347 = vmatpush3.msra.mxu0 %v59_v1  ;;  %384 = vmatpush3.msra.mxu1 %v59_v1  ;;  %v43_v11 = vld [vmem:[%s594_s0 + $0x18] sm:$0xff]  ;;  %v44_v13 = vld [vmem:[%s594_s0 + $0x20] sm:$0xff]  ;;  %v45_v15 = vld [vmem:[%s594_s0 + $0x28] sm:$0xff] }
  0x21   :  { %348 = vmatprep.subr.mxu0 %v58_v2  ;;  %380 = vmatprep.subr.mxu1 %v58_v2  ;;  %v51_v12 = vld [vmem:[%s594_s0 + $0x58] sm:$0xff]  ;;  %v52_v14 = vld [vmem:[%s594_s0 + $0x60] sm:$0xff]  ;;  %v53_v16 = vld [vmem:[%s594_s0 + $0x68] sm:$0xff] }
  0x22   :  { %349 = vmatpush3.msra.mxu0 %v58_v2  ;;  %385 = vmatpush3.msra.mxu1 %v58_v2  ;;  %v46_v17 = vld [vmem:[%s594_s0 + $0x30] sm:$0xff]  ;;  %v47_v19 = vld [vmem:[%s594_s0 + $0x38] sm:$0xff]  ;;  %v305_v21 = vld [vmem:[#allocation4] ss:$0 sm:$0xff] }
  0x23   :  { %350 = vmatprep.subr.mxu0 %v57_v3  ;;  %381 = vmatprep.subr.mxu1 %v57_v3  ;;  %v54_v18 = vld [vmem:[%s594_s0 + $0x70] sm:$0xff]  ;;  %v55_v20 = vld [vmem:[%s594_s0 + $0x78] sm:$0xff] }
  0x24   :  { %351 = vmatpush3.msra.mxu0 %v57_v3  ;;  %386 = vmatpush3.msra.mxu1 %v57_v3 }
  0x25   :  { %352 = vmatprep.subr.mxu0 %v56_v4  ;;  %382 = vmatprep.subr.mxu1 %v56_v4 }
  0x26   :  { %353 = vmatpush3.msra.mxu0 %v56_v4  ;;  %387 = vmatpush3.msra.mxu1 %v56_v4 }
  0x27   :  { %354 = vmatprep.mubr.msk.f32.mxu0 %vm68_vm1, %v40_v5  ;;  %366 = vmatprep.mubr.msk.f32.mxu1 %vm68_vm1, %v48_v6 }
  0x28   :  { %355 = vmatmul.mubr.msk.f32.vlgmr.msra.gmra.mxu0 %vm68_vm1, %v41_v7  ;;  %367 = vmatmul.mubr.msk.f32.vlgmr.msra.gmra.mxu1 %vm68_vm1, %v49_v8 }
  0x29   :  { %357 = vmatprep.mubr.msk.f32.mxu0 %vm68_vm1, %v42_v9  ;;  %369 = vmatprep.mubr.msk.f32.mxu1 %vm68_vm1, %v50_v10 }
  0x2c   :  { %358 = vmatmul.mubr.msk.f32.gmra.mxu0 %vm68_vm1, %v43_v11  ;;  %370 = vmatmul.mubr.msk.f32.gmra.mxu1 %vm68_vm1, %v51_v12 }
  0x2d   :  { %360 = vmatprep.mubr.msk.f32.mxu0 %vm68_vm1, %v44_v13  ;;  %372 = vmatprep.mubr.msk.f32.mxu1 %vm68_vm1, %v52_v14 }
  0x30   :  { %361 = vmatmul.mubr.msk.f32.gmra.mxu0 %vm68_vm1, %v45_v15  ;;  %373 = vmatmul.mubr.msk.f32.gmra.mxu1 %vm68_vm1, %v53_v16 }
  0x31   :  { %363 = vmatprep.mubr.msk.f32.mxu0 %vm68_vm1, %v46_v17  ;;  %375 = vmatprep.mubr.msk.f32.mxu1 %vm68_vm1, %v54_v18 }
  0x34   :  { %364 = vmatmul.mubr.msk.f32.gmra.mxu0 %vm68_vm1, %v47_v19  ;;  %376 = vmatmul.mubr.msk.f32.gmra.mxu1 %vm68_vm1, %v55_v20 }
  0xe8   :  { %v356_v22 = vpop.f32.mrf.mxu0  ;;  %v368_v23 = vpop.f32.mrf.mxu1 }
  0xe9   :  { %v193_v24 = vadd.f32 %v356_v22, %v305_v21  ;;  %v233_v25 = vadd.f32 %v368_v23, %v305_v21 }
  0xea   :  { %v187_v26 = vpop.f32.mrf.mxu0  ;;  %v227_v27 = vpop.f32.mrf.mxu1 }
  0xeb   :  { %v267_v28 = vmax.f32 %v193_v24, 0.0  ;;  %v275_v29 = vmax.f32 %v233_v25, 0.0  ;;  %v188_v30 = vadd.f32 %v305_v21, %v187_v26  ;;  %v228_v31 = vadd.f32 %v305_v21, %v227_v27 }
  0xec   :  { %v359_v32 = vpop.f32.mrf.mxu0  ;;  %v371_v33 = vpop.f32.mrf.mxu1 }
  0xed   :  { %284 = vst.msk [vmem:[%s597_s3 + $0x8] sm:$0xff] %vm282_vm2, %v267_v28  ;;  %292 = vst.msk [vmem:[%s597_s3 + $0x48] sm:$0xff] %vm282_vm2, %v275_v29  ;;  %v266_v34 = vmax.f32 %v188_v30, 0.0  ;;  %v274_v35 = vmax.f32 %v228_v31, 0.0  ;;  %v203_v36 = vadd.f32 %v359_v32, %v305_v21  ;;  %v243_v37 = vadd.f32 %v371_v33, %v305_v21 }
  0xee   :  { %v197_v38 = vpop.f32.mrf.mxu0  ;;  %v237_v39 = vpop.f32.mrf.mxu1 }
  0xef   :  { %283 = vst.msk [vmem:[%s597_s3] sm:$0xff] %vm282_vm2, %v266_v34  ;;  %291 = vst.msk [vmem:[%s597_s3 + $0x40] sm:$0xff] %vm282_vm2, %v274_v35  ;;  %v269_v40 = vmax.f32 %v203_v36, 0.0  ;;  %v277_v41 = vmax.f32 %v243_v37, 0.0  ;;  %v198_v42 = vadd.f32 %v305_v21, %v197_v38  ;;  %v238_v43 = vadd.f32 %v305_v21, %v237_v39 }
  0xf0   :  { %v362_v44 = vpop.f32.mrf.mxu0  ;;  %v374_v45 = vpop.f32.mrf.mxu1 }
  0xf1   :  { %286 = vst.msk [vmem:[%s597_s3 + $0x18] sm:$0xff] %vm282_vm2, %v269_v40  ;;  %294 = vst.msk [vmem:[%s597_s3 + $0x58] sm:$0xff] %vm282_vm2, %v277_v41  ;;  %v268_v46 = vmax.f32 %v198_v42, 0.0  ;;  %v276_v47 = vmax.f32 %v238_v43, 0.0  ;;  %v213_v48 = vadd.f32 %v362_v44, %v305_v21  ;;  %v253_v49 = vadd.f32 %v374_v45, %v305_v21 }
  0xf2   :  { %v207_v50 = vpop.f32.mrf.mxu0  ;;  %v247_v51 = vpop.f32.mrf.mxu1 }
  0xf3   :  { %285 = vst.msk [vmem:[%s597_s3 + $0x10] sm:$0xff] %vm282_vm2, %v268_v46  ;;  %293 = vst.msk [vmem:[%s597_s3 + $0x50] sm:$0xff] %vm282_vm2, %v276_v47  ;;  %v271_v52 = vmax.f32 %v213_v48, 0.0  ;;  %v279_v53 = vmax.f32 %v253_v49, 0.0  ;;  %v208_v54 = vadd.f32 %v305_v21, %v207_v50  ;;  %v248_v55 = vadd.f32 %v305_v21, %v247_v51 }
  0xf4   :  { %v365_v56 = vpop.f32.mrf.mxu0  ;;  %v377_v57 = vpop.f32.mrf.mxu1 }
  0xf5   :  { %288 = vst.msk [vmem:[%s597_s3 + $0x28] sm:$0xff] %vm282_vm2, %v271_v52  ;;  %296 = vst.msk [vmem:[%s597_s3 + $0x68] sm:$0xff] %vm282_vm2, %v279_v53  ;;  %v270_v58 = vmax.f32 %v208_v54, 0.0  ;;  %v278_v59 = vmax.f32 %v248_v55, 0.0  ;;  %v223_v60 = vadd.f32 %v365_v56, %v305_v21  ;;  %v263_v61 = vadd.f32 %v377_v57, %v305_v21 }
  0xf6   :  { %v217_v62 = vpop.f32.mrf.mxu0  ;;  %v257_v63 = vpop.f32.mrf.mxu1 }
  0xf7   :  { %287 = vst.msk [vmem:[%s597_s3 + $0x20] sm:$0xff] %vm282_vm2, %v270_v58  ;;  %295 = vst.msk [vmem:[%s597_s3 + $0x60] sm:$0xff] %vm282_vm2, %v278_v59  ;;  %v273_v0 = vmax.f32 %v223_v60, 0.0  ;;  %v281_v1 = vmax.f32 %v263_v61, 0.0  ;;  %v218_v2 = vadd.f32 %v305_v21, %v217_v62  ;;  %v258_v3 = vadd.f32 %v305_v21, %v257_v63 }
  0xf9   :  { %290 = vst.msk [vmem:[%s597_s3 + $0x38] sm:$0xff] %vm282_vm2, %v273_v0  ;;  %298 = vst.msk [vmem:[%s597_s3 + $0x78] sm:$0xff] %vm282_vm2, %v281_v1  ;;  %v272_v4 = vmax.f32 %v218_v2, 0.0  ;;  %v280_v5 = vmax.f32 %v258_v3, 0.0 }
  0xfb   :  { %289 = vst.msk [vmem:[%s597_s3 + $0x30] sm:$0xff] %vm282_vm2, %v272_v4  ;;  %297 = vst.msk [vmem:[%s597_s3 + $0x70] sm:$0xff] %vm282_vm2, %v280_v5 }
  0xfc   :  { %303 = vsyncpa [#allocation3], 1 }
  0xfd   :  { %304 = vsyncpa [#allocation5], 1 }

// kernel: _lambda_.4
= control target key start
LH: loop header
LB: loop body
LE: loop exit
PB: predicated region body
PF: predicated region fallthrough
CT: control target
= control target key end

     0   :  { %vm105_vm0 = vcmask 261120   ;;  %vm460_vm1 = vcmask 523264   ;;  %s1059_s1 = inlined_call_operand.vmem [shape: f32[288,64], index: 1, kind: input, shape index: {}]   ;;  %s1060_s0 = inlined_call_operand.vmem [shape: f32[128,288], index: 0, kind: input, shape index: {}]   ;;  %s1061_s2 = inlined_call_operand.vmem [shape: f32[1,64], index: 2, kind: input, shape index: {}]   ;;  %s1062_s3 = inlined_call_operand.vmem [shape: f32[128,64], index: 3, kind: output, shape index: {}]  }
   0x1   :  { %v93_v0 = vld [vmem:[%s1059_s1 + $0xf8] sm:$0xff]  ;;  %v92_v2 = vld [vmem:[%s1059_s1 + $0xf0] sm:$0xff]  ;;  %v91_v4 = vld [vmem:[%s1059_s1 + $0xe8] sm:$0xff] }
   0x2   :  { %v77_v1 = vld [vmem:[%s1059_s1 + $0x78] sm:$0xff]  ;;  %498 = vmatprep.subr.mxu0 %v93_v0  ;;  %630 = vmatprep.subr.mxu1 %v93_v0  ;;  %v76_v3 = vld [vmem:[%s1059_s1 + $0x70] sm:$0xff]  ;;  %v75_v5 = vld [vmem:[%s1059_s1 + $0x68] sm:$0xff] }
   0x3   :  { %499 = vmatpush3.msra.mxu0 %v77_v1  ;;  %646 = vmatpush3.msra.mxu1 %v77_v1  ;;  %v90_v6 = vld [vmem:[%s1059_s1 + $0xe0] sm:$0xff]  ;;  %v89_v8 = vld [vmem:[%s1059_s1 + $0xd8] sm:$0xff]  ;;  %v88_v10 = vld [vmem:[%s1059_s1 + $0xd0] sm:$0xff] }
   0x4   :  { %500 = vmatprep.subr.mxu0 %v92_v2  ;;  %631 = vmatprep.subr.mxu1 %v92_v2  ;;  %v74_v7 = vld [vmem:[%s1059_s1 + $0x60] sm:$0xff]  ;;  %v73_v9 = vld [vmem:[%s1059_s1 + $0x58] sm:$0xff]  ;;  %v72_v11 = vld [vmem:[%s1059_s1 + $0x50] sm:$0xff] }
   0x5   :  { %501 = vmatpush3.msra.mxu0 %v76_v3  ;;  %647 = vmatpush3.msra.mxu1 %v76_v3  ;;  %v87_v12 = vld [vmem:[%s1059_s1 + $0xc8] sm:$0xff]  ;;  %v86_v14 = vld [vmem:[%s1059_s1 + $0xc0] sm:$0xff]  ;;  %v85_v16 = vld [vmem:[%s1059_s1 + $0xb8] sm:$0xff] }
   0x6   :  { %502 = vmatprep.subr.mxu0 %v91_v4  ;;  %632 = vmatprep.subr.mxu1 %v91_v4  ;;  %v71_v13 = vld [vmem:[%s1059_s1 + $0x48] sm:$0xff]  ;;  %v70_v15 = vld [vmem:[%s1059_s1 + $0x40] sm:$0xff]  ;;  %v69_v17 = vld [vmem:[%s1059_s1 + $0x38] sm:$0xff] }
   0x7   :  { %503 = vmatpush3.msra.mxu0 %v75_v5  ;;  %648 = vmatpush3.msra.mxu1 %v75_v5  ;;  %v84_v18 = vld [vmem:[%s1059_s1 + $0xb0] sm:$0xff]  ;;  %v83_v20 = vld [vmem:[%s1059_s1 + $0xa8] sm:$0xff]  ;;  %v82_v22 = vld [vmem:[%s1059_s1 + $0xa0] sm:$0xff] }
   0x8   :  { %504 = vmatprep.subr.mxu0 %v90_v6  ;;  %633 = vmatprep.subr.mxu1 %v90_v6  ;;  %v68_v19 = vld [vmem:[%s1059_s1 + $0x30] sm:$0xff]  ;;  %v67_v21 = vld [vmem:[%s1059_s1 + $0x28] sm:$0xff]  ;;  %v66_v23 = vld [vmem:[%s1059_s1 + $0x20] sm:$0xff] }
   0x9   :  { %505 = vmatpush3.msra.mxu0 %v74_v7  ;;  %649 = vmatpush3.msra.mxu1 %v74_v7  ;;  %v81_v24 = vld [vmem:[%s1059_s1 + $0x98] sm:$0xff]  ;;  %v80_v26 = vld [vmem:[%s1059_s1 + $0x90] sm:$0xff]  ;;  %v79_v28 = vld [vmem:[%s1059_s1 + $0x88] sm:$0xff] }
   0xa   :  { %506 = vmatprep.subr.mxu0 %v89_v8  ;;  %634 = vmatprep.subr.mxu1 %v89_v8  ;;  %v65_v25 = vld [vmem:[%s1059_s1 + $0x18] sm:$0xff]  ;;  %v64_v27 = vld [vmem:[%s1059_s1 + $0x10] sm:$0xff]  ;;  %v63_v29 = vld [vmem:[%s1059_s1 + $0x8] sm:$0xff] }
   0xb   :  { %507 = vmatpush3.msra.mxu0 %v73_v9  ;;  %650 = vmatpush3.msra.mxu1 %v73_v9  ;;  %v78_v30 = vld [vmem:[%s1059_s1 + $0x80] sm:$0xff]  ;;  %v15_v32 = vld [vmem:[%s1060_s0 + $0x8] sm:$0xff]  ;;  %v97_v38 = vld [vmem:[%s1059_s1 + $0x118] sm:$0xff] }
   0xc   :  { %508 = vmatprep.subr.mxu0 %v88_v10  ;;  %635 = vmatprep.subr.mxu1 %v88_v10  ;;  %v62_v31 = vld [vmem:[%s1059_s1] sm:$0xff]  ;;  %v51_v33 = vld [vmem:[%s1060_s0 + $0x128] sm:$0xff]  ;;  %v17_v39 = vld [vmem:[%s1060_s0 + $0x18] sm:$0xff] }
   0xd   :  { %509 = vmatpush3.msra.mxu0 %v72_v11  ;;  %651 = vmatpush3.msra.mxu1 %v72_v11  ;;  %v14_v34 = vld [vmem:[%s1060_s0] sm:$0xff]  ;;  %v53_v40 = vld [vmem:[%s1060_s0 + $0x138] sm:$0xff]  ;;  %v96_v43 = vld [vmem:[%s1059_s1 + $0x110] sm:$0xff] }
   0xe   :  { %510 = vmatprep.subr.mxu0 %v87_v12  ;;  %636 = vmatprep.subr.mxu1 %v87_v12  ;;  %v50_v35 = vld [vmem:[%s1060_s0 + $0x120] sm:$0xff]  ;;  %v21_v41 = vld [vmem:[%s1060_s0 + $0x38] sm:$0xff]  ;;  %v20_v44 = vld [vmem:[%s1060_s0 + $0x30] sm:$0xff] }
   0xf   :  { %511 = vmatpush3.msra.mxu0 %v71_v13  ;;  %652 = vmatpush3.msra.mxu1 %v71_v13  ;;  %v18_v36 = vld [vmem:[%s1060_s0 + $0x20] sm:$0xff]  ;;  %v57_v42 = vld [vmem:[%s1060_s0 + $0x158] sm:$0xff]  ;;  %v56_v45 = vld [vmem:[%s1060_s0 + $0x150] sm:$0xff] }
  0x10   :  { %512 = vmatprep.subr.mxu0 %v86_v14  ;;  %637 = vmatprep.subr.mxu1 %v86_v14  ;;  %v54_v37 = vld [vmem:[%s1060_s0 + $0x140] sm:$0xff]  ;;  %v24_v46 = vld [vmem:[%s1060_s0 + $0x50] sm:$0xff]  ;;  %v95_v48 = vld [vmem:[%s1059_s1 + $0x108] sm:$0xff] }
  0x11   :  { %513 = vmatpush3.msra.mxu0 %v70_v15  ;;  %653 = vmatpush3.msra.mxu1 %v70_v15  ;;  %v60_v47 = vld [vmem:[%s1060_s0 + $0x170] sm:$0xff]  ;;  %v23_v49 = vld [vmem:[%s1060_s0 + $0x48] sm:$0xff]  ;;  %v94_v51 = vld [vmem:[%s1059_s1 + $0x100] sm:$0xff] }
  0x12   :  { %514 = vmatprep.subr.mxu0 %v85_v16  ;;  %638 = vmatprep.subr.mxu1 %v85_v16  ;;  %v59_v50 = vld [vmem:[%s1060_s0 + $0x168] sm:$0xff]  ;;  %v16_v53 = vld [vmem:[%s1060_s0 + $0x10] sm:$0xff]  ;;  %v26_v54 = vld [vmem:[%s1060_s0 + $0x60] sm:$0xff] }
  0x13   :  { %515 = vmatpush3.msra.mxu0 %v69_v17  ;;  %654 = vmatpush3.msra.mxu1 %v69_v17  ;;  %v27_v52 = vld [vmem:[%s1060_s0 + $0x68] sm:$0xff]  ;;  %v30_v56 = vld [vmem:[%s1060_s0 + $0x80] sm:$0xff]  ;;  %v29_v58 = vld [vmem:[%s1060_s0 + $0x78] sm:$0xff] }
  0x14   :  { %516 = vmatprep.subr.mxu0 %v84_v18  ;;  %639 = vmatprep.subr.mxu1 %v84_v18  ;;  %v19_v55 = vld [vmem:[%s1060_s0 + $0x28] sm:$0xff]  ;;  %v22_v57 = vld [vmem:[%s1060_s0 + $0x40] sm:$0xff]  ;;  %v25_v59 = vld [vmem:[%s1060_s0 + $0x58] sm:$0xff] }
  0x15   :  { %517 = vmatpush3.msra.mxu0 %v68_v19  ;;  %655 = vmatpush3.msra.mxu1 %v68_v19  ;;  %v33_v60 = vld [vmem:[%s1060_s0 + $0x98] sm:$0xff]  ;;  %v28_v61 = vld [vmem:[%s1060_s0 + $0x70] sm:$0xff]  ;;  %v31_v63 = vld [vmem:[%s1060_s0 + $0x88] sm:$0xff] }
  0x16   :  { %518 = vmatprep.subr.mxu0 %v83_v20  ;;  %640 = vmatprep.subr.mxu1 %v83_v20  ;;  %v32_v62 = vld [vmem:[%s1060_s0 + $0x90] sm:$0xff]  ;;  %v34_v1 = vld [vmem:[%s1060_s0 + $0xa0] sm:$0xff]  ;;  %v35_v2 = vld [vmem:[%s1060_s0 + $0xa8] sm:$0xff] }
  0x17   :  { %519 = vmatpush3.msra.mxu0 %v67_v21  ;;  %656 = vmatpush3.msra.mxu1 %v67_v21  ;;  %v36_v0 = vld [vmem:[%s1060_s0 + $0xb0] sm:$0xff]  ;;  %v37_v3 = vld [vmem:[%s1060_s0 + $0xb8] sm:$0xff]  ;;  %v39_v4 = vld [vmem:[%s1060_s0 + $0xc8] sm:$0xff] }
  0x18   :  { %520 = vmatprep.subr.mxu0 %v82_v22  ;;  %641 = vmatprep.subr.mxu1 %v82_v22  ;;  %v40_v5 = vld [vmem:[%s1060_s0 + $0xd0] sm:$0xff]  ;;  %v38_v6 = vld [vmem:[%s1060_s0 + $0xc0] sm:$0xff]  ;;  %v43_v7 = vld [vmem:[%s1060_s0 + $0xe8] sm:$0xff] }
  0x19   :  { %521 = vmatpush3.msra.mxu0 %v66_v23  ;;  %657 = vmatpush3.msra.mxu1 %v66_v23  ;;  %v42_v8 = vld [vmem:[%s1060_s0 + $0xe0] sm:$0xff]  ;;  %v41_v10 = vld [vmem:[%s1060_s0 + $0xd8] sm:$0xff]  ;;  %v52_v13 = vld [vmem:[%s1060_s0 + $0x130] sm:$0xff] }
  0x1a   :  { %522 = vmatprep.subr.mxu0 %v81_v24  ;;  %642 = vmatprep.subr.mxu1 %v81_v24  ;;  %v46_v9 = vld [vmem:[%s1060_s0 + $0x100] sm:$0xff]  ;;  %v49_v11 = vld [vmem:[%s1060_s0 + $0x118] sm:$0xff]  ;;  %v44_v14 = vld [vmem:[%s1060_s0 + $0xf0] sm:$0xff] }
  0x1b   :  { %523 = vmatpush3.msra.mxu0 %v65_v25  ;;  %658 = vmatpush3.msra.mxu1 %v65_v25  ;;  %v45_v12 = vld [vmem:[%s1060_s0 + $0xf8] sm:$0xff]  ;;  %v55_v15 = vld [vmem:[%s1060_s0 + $0x148] sm:$0xff]  ;;  %v48_v16 = vld [vmem:[%s1060_s0 + $0x110] sm:$0xff] }
  0x1c   :  { %524 = vmatprep.subr.mxu0 %v80_v26  ;;  %643 = vmatprep.subr.mxu1 %v80_v26  ;;  %v58_v17 = vld [vmem:[%s1060_s0 + $0x160] sm:$0xff]  ;;  %v47_v18 = vld [vmem:[%s1060_s0 + $0x108] sm:$0xff]  ;;  %v61_v19 = vld [vmem:[%s1060_s0 + $0x178] sm:$0xff] }
  0x1d   :  { %525 = vmatpush3.msra.mxu0 %v64_v27  ;;  %659 = vmatpush3.msra.mxu1 %v64_v27 }
  0x1e   :  { %526 = vmatprep.subr.mxu0 %v79_v28  ;;  %644 = vmatprep.subr.mxu1 %v79_v28 }
  0x1f   :  { %527 = vmatpush3.msra.mxu0 %v63_v29  ;;  %660 = vmatpush3.msra.mxu1 %v63_v29 }
  0x20   :  { %528 = vmatprep.subr.mxu0 %v78_v30  ;;  %645 = vmatprep.subr.mxu1 %v78_v30 }
  0x21   :  { %529 = vmatpush3.msra.mxu0 %v62_v31  ;;  %661 = vmatpush3.msra.mxu1 %v62_v31 }
  0x22   :  { %218 = vmatprep.mubr.f32.mxu0 %v15_v32  ;;  %278 = vmatprep.mubr.f32.mxu1 %v51_v33 }
  0x23   :  { %219 = vmatmul.mubr.f32.vlgmr.msra.gmra.mxu0 %v14_v34  ;;  %279 = vmatmul.mubr.f32.vlgmr.msra.gmra.mxu1 %v50_v35 }
  0x24   :  { %223 = vmatprep.mubr.f32.mxu0 %v18_v36  ;;  %283 = vmatprep.mubr.f32.mxu1 %v54_v37 }
  0x25   :  { %598 = vmatprep.subr.mxu1 %v97_v38 }
  0x26   :  { %599 = vmatpush3.msra.mxu1 %v97_v38  ;;  %v969_v38 = vld [vmem:[%s1061_s2] ss:$0 sm:$0xff] }
  0x27   :  { %224 = vmatmul.mubr.f32.gmra.mxu0 %v17_v39  ;;  %284 = vmatmul.mubr.f32.gmra.mxu1 %v53_v40 }
  0x28   :  { %228 = vmatprep.mubr.f32.mxu0 %v21_v41  ;;  %288 = vmatprep.mubr.f32.mxu1 %v57_v42 }
  0x29   :  { %600 = vmatprep.subr.mxu1 %v96_v43 }
  0x2a   :  { %601 = vmatpush3.msra.mxu1 %v96_v43 }
  0x2b   :  { %229 = vmatmul.mubr.f32.gmra.mxu0 %v20_v44  ;;  %289 = vmatmul.mubr.f32.gmra.mxu1 %v56_v45 }
  0x2c   :  { %233 = vmatprep.mubr.f32.mxu0 %v24_v46  ;;  %293 = vmatprep.mubr.f32.mxu1 %v60_v47 }
  0x2d   :  { %602 = vmatprep.subr.mxu1 %v95_v48 }
  0x2e   :  { %603 = vmatpush3.msra.mxu1 %v95_v48 }
  0x2f   :  { %234 = vmatmul.mubr.f32.gmra.mxu0 %v23_v49  ;;  %294 = vmatmul.mubr.f32.gmra.mxu1 %v59_v50 }
  0x30   :  { %604 = vmatprep.subr.mxu1 %v94_v51  ;;  %238 = vmatprep.mubr.f32.mxu0 %v27_v52 }
  0x31   :  { %605 = vmatpush3.msra.mxu1 %v94_v51  ;;  %606 = vmatprep.mubr.msk.f32.mxu1 %vm105_vm0, %v16_v53 }
  0x33   :  { %239 = vmatmul.mubr.f32.gmra.mxu0 %v26_v54  ;;  %607 = vmatmul.mubr.msk.f32.vlgmr.msra.gmra.mxu1 %vm105_vm0, %v19_v55 }
  0x34   :  { %243 = vmatprep.mubr.f32.mxu0 %v30_v56  ;;  %609 = vmatprep.mubr.msk.f32.mxu1 %vm105_vm0, %v22_v57 }
  0x37   :  { %244 = vmatmul.mubr.f32.gmra.mxu0 %v29_v58  ;;  %610 = vmatmul.mubr.msk.f32.gmra.mxu1 %vm105_vm0, %v25_v59 }
  0x38   :  { %248 = vmatprep.mubr.f32.mxu0 %v33_v60  ;;  %612 = vmatprep.mubr.msk.f32.mxu1 %vm105_vm0, %v28_v61 }
  0x3b   :  { %249 = vmatmul.mubr.f32.gmra.mxu0 %v32_v62  ;;  %613 = vmatmul.mubr.msk.f32.gmra.mxu1 %vm105_vm0, %v31_v63 }
  0x3c   :  { %253 = vmatprep.mubr.f32.mxu0 %v36_v0  ;;  %615 = vmatprep.mubr.msk.f32.mxu1 %vm105_vm0, %v34_v1 }
  0x3f   :  { %254 = vmatmul.mubr.f32.gmra.mxu0 %v35_v2  ;;  %616 = vmatmul.mubr.msk.f32.gmra.mxu1 %vm105_vm0, %v37_v3 }
  0x40   :  { %258 = vmatprep.mubr.f32.mxu0 %v39_v4  ;;  %618 = vmatprep.mubr.msk.f32.mxu1 %vm105_vm0, %v40_v5 }
  0x43   :  { %259 = vmatmul.mubr.f32.gmra.mxu0 %v38_v6  ;;  %619 = vmatmul.mubr.msk.f32.gmra.mxu1 %vm105_vm0, %v43_v7 }
  0x44   :  { %263 = vmatprep.mubr.f32.mxu0 %v42_v8  ;;  %621 = vmatprep.mubr.msk.f32.mxu1 %vm105_vm0, %v46_v9 }
  0x47   :  { %264 = vmatmul.mubr.f32.gmra.mxu0 %v41_v10  ;;  %622 = vmatmul.mubr.msk.f32.gmra.mxu1 %vm105_vm0, %v49_v11 }
  0x48   :  { %268 = vmatprep.mubr.f32.mxu0 %v45_v12  ;;  %624 = vmatprep.mubr.msk.f32.mxu1 %vm105_vm0, %v52_v13 }
  0x4b   :  { %269 = vmatmul.mubr.f32.gmra.mxu0 %v44_v14  ;;  %625 = vmatmul.mubr.msk.f32.gmra.mxu1 %vm105_vm0, %v55_v15 }
  0x4c   :  { %273 = vmatprep.mubr.f32.mxu0 %v48_v16  ;;  %627 = vmatprep.mubr.msk.f32.mxu1 %vm105_vm0, %v58_v17 }
  0x4f   :  { %274 = vmatmul.mubr.f32.gmra.mxu0 %v47_v18  ;;  %628 = vmatmul.mubr.msk.f32.gmra.mxu1 %vm105_vm0, %v61_v19 }
  0xe3   :  { %v530_v20 = vpop.f32.mrf.mxu0  ;;  %v950_v21 = vpop.f32.mrf.mxu1 }
  0xe5   :  { %v531_v22 = vpop.f32.mrf.mxu0  ;;  %v952_v23 = vpop.f32.mrf.mxu1 }
  0xe6   :  { %v532_v35 = vadd.f32 %v531_v22, %v530_v20 }
  0xe7   :  { %v533_v24 = vpop.f32.mrf.mxu0  ;;  %v954_v25 = vpop.f32.mrf.mxu1 }
  0xe8   :  { %v221_v45 = vadd.f32 %v532_v35, %v969_v38  ;;  %v568_v35 = vadd.f32 %v952_v23, %v950_v21 }
  0xe9   :  { %v534_v26 = vpop.f32.mrf.mxu0  ;;  %v956_v27 = vpop.f32.mrf.mxu1 }
  0xea   :  { %v535_v32 = vadd.f32 %v534_v26, %v533_v24  ;;  %v571_v26 = vadd.f32 %v956_v27, %v954_v25 }
  0xeb   :  { %v536_v28 = vpop.f32.mrf.mxu0  ;;  %v958_v29 = vpop.f32.mrf.mxu1 }
  0xec   :  { %v226_v40 = vadd.f32 %v535_v32, %v969_v38 }
  0xed   :  { %v537_v30 = vpop.f32.mrf.mxu0  ;;  %v960_v31 = vpop.f32.mrf.mxu1 }
  0xee   :  { %v538_v43 = vadd.f32 %v537_v30, %v536_v28  ;;  %v574_v21 = vadd.f32 %v960_v31, %v958_v29 }
  0xef   :  { %v539_v33 = vpop.f32.mrf.mxu0  ;;  %v962_v34 = vpop.f32.mrf.mxu1 }
  0xf0   :  { %v231_v56 = vadd.f32 %v538_v43, %v969_v38  ;;  %v286_v43 = vadd.f32 %v571_v26, %v969_v38 }
  0xf1   :  { %v540_v36 = vpop.f32.mrf.mxu0  ;;  %v964_v37 = vpop.f32.mrf.mxu1 }
  0xf2   :  { %v541_v39 = vadd.f32 %v540_v36, %v539_v33 }
  0xf3   :  { %v542_v41 = vpop.f32.mrf.mxu0  ;;  %v608_v42 = vpop.f32.mrf.mxu1 }
  0xf4   :  { %v371_v44 = vadd.f32 %v608_v42, %v226_v40  ;;  %v236_v50 = vadd.f32 %v541_v39, %v969_v38  ;;  %v577_v40 = vadd.f32 %v964_v37, %v962_v34  ;;  %v281_v37 = vadd.f32 %v568_v35, %v969_v38 }
  0xf5   :  { %v543_v46 = vpop.f32.mrf.mxu0  ;;  %v365_v47 = vpop.f32.mrf.mxu1 }
  0xf6   :  { %v445_v48 = vmax.f32 %v371_v44, 0.0  ;;  %v366_v49 = vadd.f32 %v365_v47, %v221_v45  ;;  %v544_v53 = vadd.f32 %v543_v46, %v542_v41 }
  0xf7   :  { %v545_v51 = vpop.f32.mrf.mxu0  ;;  %v611_v52 = vpop.f32.mrf.mxu1 }
  0xf8   :  { %462 = vst.msk [vmem:[%s1062_s3 + $0x8] sm:$0xff] %vm460_vm1, %v445_v48  ;;  %v444_v54 = vmax.f32 %v366_v49, 0.0  ;;  %v381_v55 = vadd.f32 %v611_v52, %v236_v50  ;;  %v241_v2 = vadd.f32 %v544_v53, %v969_v38  ;;  %v296_v49 = vadd.f32 %v577_v40, %v969_v38 }
  0xf9   :  { %v546_v57 = vpop.f32.mrf.mxu0  ;;  %v375_v58 = vpop.f32.mrf.mxu1 }
  0xfa   :  { %461 = vst.msk [vmem:[%s1062_s3] sm:$0xff] %vm460_vm1, %v444_v54  ;;  %v447_v59 = vmax.f32 %v381_v55, 0.0  ;;  %v547_v60 = vadd.f32 %v546_v57, %v545_v51  ;;  %v376_v61 = vadd.f32 %v375_v58, %v231_v56  ;;  %v291_v54 = vadd.f32 %v574_v21, %v969_v38 }
  0xfb   :  { %v548_v62 = vpop.f32.mrf.mxu0  ;;  %v614_v63 = vpop.f32.mrf.mxu1 }
  0xfc   :  { %464 = vst.msk [vmem:[%s1062_s3 + $0x18] sm:$0xff] %vm460_vm1, %v447_v59  ;;  %v446_v0 = vmax.f32 %v376_v61, 0.0  ;;  %v246_v1 = vadd.f32 %v547_v60, %v969_v38 }
  0xfd   :  { %v549_v3 = vpop.f32.mrf.mxu0  ;;  %v385_v4 = vpop.f32.mrf.mxu1 }
  0xfe   :  { %463 = vst.msk [vmem:[%s1062_s3 + $0x10] sm:$0xff] %vm460_vm1, %v446_v0  ;;  %v391_v5 = vadd.f32 %v614_v63, %v246_v1  ;;  %v550_v6 = vadd.f32 %v549_v3, %v548_v62  ;;  %v386_v7 = vadd.f32 %v385_v4, %v241_v2 }
  0xff   :  { %v551_v8 = vpop.f32.mrf.mxu0  ;;  %v617_v9 = vpop.f32.mrf.mxu1 }
 0x100   :  { %v449_v10 = vmax.f32 %v391_v5, 0.0  ;;  %v448_v11 = vmax.f32 %v386_v7, 0.0  ;;  %v251_v12 = vadd.f32 %v550_v6, %v969_v38 }
 0x101   :  { %v552_v13 = vpop.f32.mrf.mxu0  ;;  %v395_v14 = vpop.f32.mrf.mxu1 }
 0x102   :  { %466 = vst.msk [vmem:[%s1062_s3 + $0x28] sm:$0xff] %vm460_vm1, %v449_v10  ;;  %465 = vst.msk [vmem:[%s1062_s3 + $0x20] sm:$0xff] %vm460_vm1, %v448_v11  ;;  %v553_v15 = vadd.f32 %v552_v13, %v551_v8  ;;  %v396_v16 = vadd.f32 %v395_v14, %v251_v12 }
 0x103   :  { %v554_v17 = vpop.f32.mrf.mxu0  ;;  %v620_v18 = vpop.f32.mrf.mxu1 }
 0x104   :  { %v256_v19 = vadd.f32 %v553_v15, %v969_v38  ;;  %v450_v20 = vmax.f32 %v396_v16, 0.0 }
 0x105   :  { %v555_v22 = vpop.f32.mrf.mxu0  ;;  %v405_v24 = vpop.f32.mrf.mxu1 }
 0x106   :  { %v401_v28 = vadd.f32 %v617_v9, %v256_v19  ;;  %467 = vst.msk [vmem:[%s1062_s3 + $0x30] sm:$0xff] %vm460_vm1, %v450_v20  ;;  %v556_v30 = vadd.f32 %v555_v22, %v554_v17 }
 0x107   :  { %v557_v32 = vpop.f32.mrf.mxu0  ;;  %v623_v33 = vpop.f32.mrf.mxu1 }
 0x108   :  { %v451_v36 = vmax.f32 %v401_v28, 0.0  ;;  %v261_v39 = vadd.f32 %v556_v30, %v969_v38 }
 0x109   :  { %v558_v41 = vpop.f32.mrf.mxu0  ;;  %v415_v25 = vpop.f32.mrf.mxu1 }
 0x10a   :  { %468 = vst.msk [vmem:[%s1062_s3 + $0x38] sm:$0xff] %vm460_vm1, %v451_v36  ;;  %v406_v27 = vadd.f32 %v405_v24, %v261_v39  ;;  %v559_v42 = vadd.f32 %v558_v41, %v557_v32 }
 0x10b   :  { %v560_v23 = vpop.f32.mrf.mxu0  ;;  %v626_v44 = vpop.f32.mrf.mxu1 }
 0x10c   :  { %v452_v45 = vmax.f32 %v406_v27, 0.0  ;;  %v266_v46 = vadd.f32 %v559_v42, %v969_v38  ;;  %v431_v34 = vadd.f32 %v626_v44, %v286_v43 }
 0x10d   :  { %v561_v47 = vpop.f32.mrf.mxu0  ;;  %v425_v48 = vpop.f32.mrf.mxu1 }
 0x10e   :  { %469 = vst.msk [vmem:[%s1062_s3 + $0x40] sm:$0xff] %vm460_vm1, %v452_v45  ;;  %v411_v50 = vadd.f32 %v620_v18, %v266_v46  ;;  %v457_v51 = vmax.f32 %v431_v34, 0.0  ;;  %v562_v29 = vadd.f32 %v561_v47, %v560_v23  ;;  %v426_v31 = vadd.f32 %v425_v48, %v281_v37 }
 0x10f   :  { %v563_v52 = vpop.f32.mrf.mxu0  ;;  %v629_v53 = vpop.f32.mrf.mxu1 }
 0x110   :  { %v453_v55 = vmax.f32 %v411_v50, 0.0  ;;  %474 = vst.msk [vmem:[%s1062_s3 + $0x68] sm:$0xff] %vm460_vm1, %v457_v51  ;;  %v271_v56 = vadd.f32 %v562_v29, %v969_v38  ;;  %v456_v57 = vmax.f32 %v426_v31, 0.0  ;;  %v441_v58 = vadd.f32 %v629_v53, %v296_v49 }
 0x111   :  { %v564_v59 = vpop.f32.mrf.mxu0  ;;  %v435_v60 = vpop.f32.mrf.mxu1 }
 0x112   :  { %470 = vst.msk [vmem:[%s1062_s3 + $0x48] sm:$0xff] %vm460_vm1, %v453_v55  ;;  %v416_v61 = vadd.f32 %v415_v25, %v271_v56  ;;  %473 = vst.msk [vmem:[%s1062_s3 + $0x60] sm:$0xff] %vm460_vm1, %v456_v57  ;;  %v459_v62 = vmax.f32 %v441_v58, 0.0  ;;  %v565_v63 = vadd.f32 %v564_v59, %v563_v52  ;;  %v436_v0 = vadd.f32 %v435_v60, %v291_v54 }
 0x114   :  { %v454_v1 = vmax.f32 %v416_v61, 0.0  ;;  %476 = vst.msk [vmem:[%s1062_s3 + $0x78] sm:$0xff] %vm460_vm1, %v459_v62  ;;  %v276_v2 = vadd.f32 %v565_v63, %v969_v38  ;;  %v458_v3 = vmax.f32 %v436_v0, 0.0 }
 0x116   :  { %471 = vst.msk [vmem:[%s1062_s3 + $0x50] sm:$0xff] %vm460_vm1, %v454_v1  ;;  %v421_v4 = vadd.f32 %v623_v33, %v276_v2  ;;  %475 = vst.msk [vmem:[%s1062_s3 + $0x70] sm:$0xff] %vm460_vm1, %v458_v3 }
 0x118   :  { %v455_v5 = vmax.f32 %v421_v4, 0.0 }
 0x11a   :  { %472 = vst.msk [vmem:[%s1062_s3 + $0x58] sm:$0xff] %vm460_vm1, %v455_v5 }

// kernel: _lambda_.5
= control target key start
LH: loop header
LB: loop body
LE: loop exit
PB: predicated region body
PF: predicated region fallthrough
CT: control target
= control target key end

     0   :  { %v2791_v30 = vmov 1983009808   ;;  %v575_v32 = vlaneseq  ;;  %s4508_s0 = inlined_call_operand.vmem [shape: f32[2,4096], index: 0, kind: input, shape index: {}]   ;;  %s4509_s1 = inlined_call_operand.vmem [shape: f32[2,8], index: 1, kind: input, shape index: {}]   ;;  %s4510_s2 = inlined_call_operand.vmem [shape: f32[4096,32], index: 2, kind: input, shape index: {}]   ;;  %s4511_s3 = inlined_call_operand.vmem [shape: f32[1,32], index: 3, kind: input, shape index: {}]   ;;  %s4512_s4 = inlined_call_operand.vmem [shape: f32[40,32], index: 4, kind: input, shape index: {}]   ;;  %s4513_s5 = inlined_call_operand.vmem [shape: f32[1,32], index: 5, kind: input, shape index: {}]   ;;  %s4514_s6 = inlined_call_operand.vmem [shape: f32[32,32], index: 6, kind: input, shape index: {}]   ;;  %s4515_s7 = inlined_call_operand.vmem [shape: f32[1,32], index: 7, kind: input, shape index: {}]   ;;  %s4516_s8 = inlined_call_operand.vmem [shape: f32[32,32], index: 8, kind: input, shape index: {}]   ;;  %s4517_s9 = inlined_call_operand.vmem [shape: f32[1,32], index: 9, kind: input, shape index: {}]   ;;  %s4518_s10 = inlined_call_operand.hbm [shape: f32[2,32], index: 10, kind: output, shape index: {}]  }
   0x1   :  { %v75_v0 = vld [vmem:[%s4510_s2 + $0xf8] sm:$0xff]  ;;  %v74_v4 = vld [vmem:[%s4510_s2 + $0xf0] sm:$0xff]  ;;  %v73_v8 = vld [vmem:[%s4510_s2 + $0xe8] sm:$0xff]  ;;  %v573_v31 = vunpack.c.l.s4 %v2791_v30 }
   0x2   :  { %v107_v1 = vld [vmem:[%s4510_s2 + $0x1f8] sm:$0xff]  ;;  %2145 = vmatprep.subr.mxu0 %v75_v0  ;;  %v106_v5 = vld [vmem:[%s4510_s2 + $0x1f0] sm:$0xff]  ;;  %v105_v9 = vld [vmem:[%s4510_s2 + $0x1e8] sm:$0xff]  ;;  %v576_v42 = vshrl.u32 %v575_v32, 7 }
   0x3   :  { %v59_v2 = vld [vmem:[%s4510_s2 + $0x78] sm:$0xff]  ;;  %2180 = vmatprep.subr.mxu1 %v107_v1  ;;  %v58_v6 = vld [vmem:[%s4510_s2 + $0x70] sm:$0xff]  ;;  %v57_v10 = vld [vmem:[%s4510_s2 + $0x68] sm:$0xff]  ;;  %v574_v41 = vunpack.c.0.s8 %v573_v31 }
   0x4   :  { %v91_v3 = vld [vmem:[%s4510_s2 + $0x178] sm:$0xff]  ;;  %2146 = vmatpush3.msra.mxu0 %v59_v2  ;;  %v90_v7 = vld [vmem:[%s4510_s2 + $0x170] sm:$0xff]  ;;  %v89_v11 = vld [vmem:[%s4510_s2 + $0x168] sm:$0xff] }
   0x5   :  { %2181 = vmatpush3.msra.mxu1 %v91_v3  ;;  %2147 = vmatprep.subr.mxu0 %v74_v4  ;;  %v72_v12 = vld [vmem:[%s4510_s2 + $0xe0] sm:$0xff]  ;;  %v71_v16 = vld [vmem:[%s4510_s2 + $0xd8] sm:$0xff]  ;;  %v70_v20 = vld [vmem:[%s4510_s2 + $0xd0] sm:$0xff]  ;;  %v2989_v51 = vsub.s32 %v574_v41, %v576_v42 }
   0x6   :  { %2182 = vmatprep.subr.mxu1 %v106_v5  ;;  %2148 = vmatpush3.msra.mxu0 %v58_v6  ;;  %v104_v13 = vld [vmem:[%s4510_s2 + $0x1e0] sm:$0xff]  ;;  %v103_v17 = vld [vmem:[%s4510_s2 + $0x1d8] sm:$0xff]  ;;  %v102_v21 = vld [vmem:[%s4510_s2 + $0x1d0] sm:$0xff] }
   0x7   :  { %2183 = vmatpush3.msra.mxu1 %v90_v7  ;;  %2149 = vmatprep.subr.mxu0 %v73_v8  ;;  %v56_v14 = vld [vmem:[%s4510_s2 + $0x60] sm:$0xff]  ;;  %v55_v18 = vld [vmem:[%s4510_s2 + $0x58] sm:$0xff]  ;;  %v54_v22 = vld [vmem:[%s4510_s2 + $0x50] sm:$0xff] }
   0x8   :  { %2184 = vmatprep.subr.mxu1 %v105_v9  ;;  %v88_v15 = vld [vmem:[%s4510_s2 + $0x160] sm:$0xff]  ;;  %2150 = vmatpush3.msra.mxu0 %v57_v10  ;;  %v87_v19 = vld [vmem:[%s4510_s2 + $0x158] sm:$0xff]  ;;  %v86_v23 = vld [vmem:[%s4510_s2 + $0x150] sm:$0xff] }
   0x9   :  { %2185 = vmatpush3.msra.mxu1 %v89_v11  ;;  %2151 = vmatprep.subr.mxu0 %v72_v12  ;;  %v69_v24 = vld [vmem:[%s4510_s2 + $0xc8] sm:$0xff]  ;;  %v68_v28 = vld [vmem:[%s4510_s2 + $0xc0] sm:$0xff]  ;;  %v67_v35 = vld [vmem:[%s4510_s2 + $0xb8] sm:$0xff] }
   0xa   :  { %2186 = vmatprep.subr.mxu1 %v104_v13  ;;  %2152 = vmatpush3.msra.mxu0 %v56_v14  ;;  %v101_v25 = vld [vmem:[%s4510_s2 + $0x1c8] sm:$0xff]  ;;  %v100_v29 = vld [vmem:[%s4510_s2 + $0x1c0] sm:$0xff]  ;;  %v99_v36 = vld [vmem:[%s4510_s2 + $0x1b8] sm:$0xff] }
   0xb   :  { %2187 = vmatpush3.msra.mxu1 %v88_v15  ;;  %2153 = vmatprep.subr.mxu0 %v71_v16  ;;  %v53_v26 = vld [vmem:[%s4510_s2 + $0x48] sm:$0xff]  ;;  %v52_v33 = vld [vmem:[%s4510_s2 + $0x40] sm:$0xff]  ;;  %v51_v37 = vld [vmem:[%s4510_s2 + $0x38] sm:$0xff] }
   0xc   :  { %2188 = vmatprep.subr.mxu1 %v103_v17  ;;  %2154 = vmatpush3.msra.mxu0 %v55_v18  ;;  %v85_v27 = vld [vmem:[%s4510_s2 + $0x148] sm:$0xff]  ;;  %v84_v34 = vld [vmem:[%s4510_s2 + $0x140] sm:$0xff]  ;;  %v83_v38 = vld [vmem:[%s4510_s2 + $0x138] sm:$0xff] }
   0xd   :  { %2189 = vmatpush3.msra.mxu1 %v87_v19  ;;  %2155 = vmatprep.subr.mxu0 %v70_v20  ;;  %v66_v39 = vld [vmem:[%s4510_s2 + $0xb0] sm:$0xff]  ;;  %v65_v45 = vld [vmem:[%s4510_s2 + $0xa8] sm:$0xff]  ;;  %v64_v49 = vld [vmem:[%s4510_s2 + $0xa0] sm:$0xff] }
   0xe   :  { %2190 = vmatprep.subr.mxu1 %v102_v21  ;;  %2156 = vmatpush3.msra.mxu0 %v54_v22  ;;  %v98_v40 = vld [vmem:[%s4510_s2 + $0x1b0] sm:$0xff]  ;;  %v97_v46 = vld [vmem:[%s4510_s2 + $0x1a8] sm:$0xff]  ;;  %v96_v50 = vld [vmem:[%s4510_s2 + $0x1a0] sm:$0xff] }
   0xf   :  { %2191 = vmatpush3.msra.mxu1 %v86_v23  ;;  %2157 = vmatprep.subr.mxu0 %v69_v24  ;;  %v50_v43 = vld [vmem:[%s4510_s2 + $0x30] sm:$0xff]  ;;  %v49_v47 = vld [vmem:[%s4510_s2 + $0x28] sm:$0xff]  ;;  %v48_v52 = vld [vmem:[%s4510_s2 + $0x20] sm:$0xff] }
  0x10   :  { %2192 = vmatprep.subr.mxu1 %v101_v25  ;;  %2158 = vmatpush3.msra.mxu0 %v53_v26  ;;  %v82_v44 = vld [vmem:[%s4510_s2 + $0x130] sm:$0xff]  ;;  %v81_v48 = vld [vmem:[%s4510_s2 + $0x128] sm:$0xff]  ;;  %v80_v53 = vld [vmem:[%s4510_s2 + $0x120] sm:$0xff] }
  0x11   :  { %2193 = vmatpush3.msra.mxu1 %v85_v27  ;;  %2159 = vmatprep.subr.mxu0 %v68_v28  ;;  %v36_v54 = vld [vmem:[%s4508_s0] sm:$0xff]  ;;  %v63_v55 = vld [vmem:[%s4510_s2 + $0x98] sm:$0xff]  ;;  %v62_v60 = vld [vmem:[%s4510_s2 + $0x90] sm:$0xff] }
  0x12   :  { %2194 = vmatprep.subr.mxu1 %v100_v29  ;;  %2160 = vmatpush3.msra.mxu0 %v52_v33  ;;  %v95_v56 = vld [vmem:[%s4510_s2 + $0x198] sm:$0xff]  ;;  %v571_v57 = vcombine.high %v36_v54, %v36_v54  ;;  %v94_v61 = vld [vmem:[%s4510_s2 + $0x190] sm:$0xff]  ;;  %v578_v62 = vrot.slane %v36_v54, %v2989_v51  ;;  %v61_v1 = vld [vmem:[%s4510_s2 + $0x88] sm:$0xff] }
  0x13   :  { %2195 = vmatpush3.msra.mxu1 %v84_v34  ;;  %2161 = vmatprep.subr.mxu0 %v67_v35  ;;  %v47_v58 = vld [vmem:[%s4510_s2 + $0x18] sm:$0xff]  ;;  %v46_v63 = vld [vmem:[%s4510_s2 + $0x10] sm:$0xff]  ;;  %v93_v2 = vld [vmem:[%s4510_s2 + $0x188] sm:$0xff] }
  0x14   :  { %2196 = vmatprep.subr.mxu1 %v99_v36  ;;  %2162 = vmatpush3.msra.mxu0 %v51_v37  ;;  %v79_v59 = vld [vmem:[%s4510_s2 + $0x118] sm:$0xff]  ;;  %v78_v0 = vld [vmem:[%s4510_s2 + $0x110] sm:$0xff]  ;;  %v585_v3 = vrot.slane %v571_v57, %v2989_v51  ;;  %v45_v4 = vld [vmem:[%s4510_s2 + $0x8] sm:$0xff]  ;;  %v586_v8 = vcombine.high %v578_v62, %v578_v62 }
  0x15   :  { %2197 = vmatpush3.msra.mxu1 %v83_v38  ;;  %2163 = vmatprep.subr.mxu0 %v66_v39  ;;  %v77_v5 = vld [vmem:[%s4510_s2 + $0x108] sm:$0xff]  ;;  %v60_v6 = vld [vmem:[%s4510_s2 + $0x80] sm:$0xff]  ;;  %v139_v12 = vld [vmem:[%s4510_s2 + $0x2f8] sm:$0xff] }
  0x16   :  { %2198 = vmatprep.subr.mxu1 %v98_v40  ;;  %2164 = vmatpush3.msra.mxu0 %v50_v43  ;;  %v92_v7 = vld [vmem:[%s4510_s2 + $0x180] sm:$0xff]  ;;  %v587_v11 = vcombine.high %v585_v3, %v585_v3  ;;  %v171_v13 = vld [vmem:[%s4510_s2 + $0x3f8] sm:$0xff]  ;;  %v138_v16 = vld [vmem:[%s4510_s2 + $0x2f0] sm:$0xff] }
  0x17   :  { %2199 = vmatpush3.msra.mxu1 %v82_v44  ;;  %2165 = vmatprep.subr.mxu0 %v65_v45  ;;  %v44_v9 = vld [vmem:[%s4510_s2] sm:$0xff]  ;;  %v123_v14 = vld [vmem:[%s4510_s2 + $0x278] sm:$0xff]  ;;  %v170_v17 = vld [vmem:[%s4510_s2 + $0x3f0] sm:$0xff] }
  0x18   :  { %2200 = vmatprep.subr.mxu1 %v97_v46  ;;  %2166 = vmatpush3.msra.mxu0 %v49_v47  ;;  %v76_v10 = vld [vmem:[%s4510_s2 + $0x100] sm:$0xff]  ;;  %v155_v15 = vld [vmem:[%s4510_s2 + $0x378] sm:$0xff]  ;;  %v122_v18 = vld [vmem:[%s4510_s2 + $0x270] sm:$0xff] }
  0x19   :  { %2201 = vmatpush3.msra.mxu1 %v81_v48  ;;  %2167 = vmatprep.subr.mxu0 %v64_v49  ;;  %v154_v19 = vld [vmem:[%s4510_s2 + $0x370] sm:$0xff]  ;;  %v137_v20 = vld [vmem:[%s4510_s2 + $0x2e8] sm:$0xff]  ;;  %v136_v24 = vld [vmem:[%s4510_s2 + $0x2e0] sm:$0xff] }
  0x1a   :  { %2202 = vmatprep.subr.mxu1 %v96_v50  ;;  %2168 = vmatpush3.msra.mxu0 %v48_v52  ;;  %v169_v21 = vld [vmem:[%s4510_s2 + $0x3e8] sm:$0xff]  ;;  %v168_v25 = vld [vmem:[%s4510_s2 + $0x3e0] sm:$0xff]  ;;  %v135_v28 = vld [vmem:[%s4510_s2 + $0x2d8] sm:$0xff] }
  0x1b   :  { %2203 = vmatpush3.msra.mxu1 %v80_v53  ;;  %2169 = vmatprep.subr.mxu0 %v63_v55  ;;  %v121_v22 = vld [vmem:[%s4510_s2 + $0x268] sm:$0xff]  ;;  %v120_v26 = vld [vmem:[%s4510_s2 + $0x260] sm:$0xff]  ;;  %v167_v29 = vld [vmem:[%s4510_s2 + $0x3d8] sm:$0xff] }
  0x1c   :  { %2204 = vmatprep.subr.mxu1 %v95_v56  ;;  %2170 = vmatpush3.msra.mxu0 %v47_v58  ;;  %v153_v23 = vld [vmem:[%s4510_s2 + $0x368] sm:$0xff]  ;;  %v152_v27 = vld [vmem:[%s4510_s2 + $0x360] sm:$0xff]  ;;  %v119_v30 = vld [vmem:[%s4510_s2 + $0x258] sm:$0xff] }
  0x1d   :  { %2205 = vmatpush3.msra.mxu1 %v79_v59  ;;  %2171 = vmatprep.subr.mxu0 %v62_v60  ;;  %v151_v31 = vld [vmem:[%s4510_s2 + $0x358] sm:$0xff]  ;;  %v134_v32 = vld [vmem:[%s4510_s2 + $0x2d0] sm:$0xff]  ;;  %v133_v36 = vld [vmem:[%s4510_s2 + $0x2c8] sm:$0xff] }
  0x1e   :  { %2206 = vmatprep.subr.mxu1 %v94_v61  ;;  %2172 = vmatpush3.msra.mxu0 %v46_v63  ;;  %v166_v33 = vld [vmem:[%s4510_s2 + $0x3d0] sm:$0xff]  ;;  %v165_v37 = vld [vmem:[%s4510_s2 + $0x3c8] sm:$0xff]  ;;  %v132_v40 = vld [vmem:[%s4510_s2 + $0x2c0] sm:$0xff] }
  0x1f   :  { %2207 = vmatpush3.msra.mxu1 %v78_v0  ;;  %2173 = vmatprep.subr.mxu0 %v61_v1  ;;  %v118_v34 = vld [vmem:[%s4510_s2 + $0x250] sm:$0xff]  ;;  %v117_v38 = vld [vmem:[%s4510_s2 + $0x248] sm:$0xff]  ;;  %v164_v41 = vld [vmem:[%s4510_s2 + $0x3c0] sm:$0xff] }
  0x20   :  { %2208 = vmatprep.subr.mxu1 %v93_v2  ;;  %2174 = vmatpush3.msra.mxu0 %v45_v4  ;;  %v150_v35 = vld [vmem:[%s4510_s2 + $0x350] sm:$0xff]  ;;  %v149_v39 = vld [vmem:[%s4510_s2 + $0x348] sm:$0xff]  ;;  %v116_v42 = vld [vmem:[%s4510_s2 + $0x240] sm:$0xff] }
  0x21   :  { %2209 = vmatpush3.msra.mxu1 %v77_v5  ;;  %2175 = vmatprep.subr.mxu0 %v60_v6  ;;  %v148_v43 = vld [vmem:[%s4510_s2 + $0x340] sm:$0xff]  ;;  %v131_v44 = vld [vmem:[%s4510_s2 + $0x2b8] sm:$0xff]  ;;  %v130_v48 = vld [vmem:[%s4510_s2 + $0x2b0] sm:$0xff] }
  0x22   :  { %2210 = vmatprep.subr.mxu1 %v92_v7  ;;  %2176 = vmatpush3.msra.mxu0 %v44_v9  ;;  %v163_v45 = vld [vmem:[%s4510_s2 + $0x3b8] sm:$0xff]  ;;  %v162_v49 = vld [vmem:[%s4510_s2 + $0x3b0] sm:$0xff]  ;;  %v129_v53 = vld [vmem:[%s4510_s2 + $0x2a8] sm:$0xff] }
  0x23   :  { %803 = vmatprep.mubr.f32.mxu0 %v586_v8  ;;  %2211 = vmatpush3.msra.mxu1 %v76_v10  ;;  %v115_v46 = vld [vmem:[%s4510_s2 + $0x238] sm:$0xff]  ;;  %v114_v50 = vld [vmem:[%s4510_s2 + $0x230] sm:$0xff]  ;;  %v161_v54 = vld [vmem:[%s4510_s2 + $0x3a8] sm:$0xff] }
  0x24   :  { %804 = vmatmul.mubr.f32.vlgmr.msra.gmra.mxu0 %v578_v62  ;;  %873 = vmatprep.mubr.f32.mxu1 %v587_v11  ;;  %v147_v47 = vld [vmem:[%s4510_s2 + $0x338] sm:$0xff]  ;;  %v146_v52 = vld [vmem:[%s4510_s2 + $0x330] sm:$0xff]  ;;  %v113_v55 = vld [vmem:[%s4510_s2 + $0x228] sm:$0xff] }
  0x25   :  { %2215 = vmatprep.subr.mxu0 %v139_v12  ;;  %2250 = vmatprep.subr.mxu1 %v171_v13  ;;  %v145_v56 = vld [vmem:[%s4510_s2 + $0x328] sm:$0xff]  ;;  %v128_v58 = vld [vmem:[%s4510_s2 + $0x2a0] sm:$0xff]  ;;  %v127_v62 = vld [vmem:[%s4510_s2 + $0x298] sm:$0xff] }
  0x26   :  { %874 = vmatmul.mubr.f32.vlgmr.msra.gmra.mxu1 %v585_v3  ;;  %2216 = vmatpush3.msra.mxu0 %v123_v14  ;;  %v37_v57 = vld [vmem:[%s4508_s0 + $0x8] sm:$0xff]  ;;  %v160_v59 = vld [vmem:[%s4510_s2 + $0x3a0] sm:$0xff]  ;;  %v159_v63 = vld [vmem:[%s4510_s2 + $0x398] sm:$0xff] }
  0x27   :  { %2251 = vmatpush3.msra.mxu1 %v155_v15  ;;  %2217 = vmatprep.subr.mxu0 %v138_v16  ;;  %v112_v60 = vld [vmem:[%s4510_s2 + $0x220] sm:$0xff]  ;;  %v588_v0 = vcombine.high %v37_v57, %v37_v57  ;;  %v111_v1 = vld [vmem:[%s4510_s2 + $0x218] sm:$0xff]  ;;  %v126_v3 = vld [vmem:[%s4510_s2 + $0x290] sm:$0xff]  ;;  %v595_v5 = vrot.slane %v37_v57, %v2989_v51 }
  0x28   :  { %2252 = vmatprep.subr.mxu1 %v170_v17  ;;  %2218 = vmatpush3.msra.mxu0 %v122_v18  ;;  %v144_v61 = vld [vmem:[%s4510_s2 + $0x320] sm:$0xff]  ;;  %v143_v2 = vld [vmem:[%s4510_s2 + $0x318] sm:$0xff]  ;;  %v158_v4 = vld [vmem:[%s4510_s2 + $0x390] sm:$0xff] }
  0x29   :  { %2253 = vmatpush3.msra.mxu1 %v154_v19  ;;  %2219 = vmatprep.subr.mxu0 %v137_v20  ;;  %v110_v6 = vld [vmem:[%s4510_s2 + $0x210] sm:$0xff]  ;;  %v125_v8 = vld [vmem:[%s4510_s2 + $0x288] sm:$0xff]  ;;  %v602_v10 = vrot.slane %v588_v0, %v2989_v51  ;;  %v124_v13 = vld [vmem:[%s4510_s2 + $0x280] sm:$0xff]  ;;  %v603_v15 = vcombine.high %v595_v5, %v595_v5 }
  0x2a   :  { %2254 = vmatprep.subr.mxu1 %v169_v21  ;;  %2220 = vmatpush3.msra.mxu0 %v121_v22  ;;  %v142_v7 = vld [vmem:[%s4510_s2 + $0x310] sm:$0xff]  ;;  %v157_v9 = vld [vmem:[%s4510_s2 + $0x388] sm:$0xff]  ;;  %v156_v14 = vld [vmem:[%s4510_s2 + $0x380] sm:$0xff] }
  0x2b   :  { %2255 = vmatpush3.msra.mxu1 %v153_v23  ;;  %2221 = vmatprep.subr.mxu0 %v136_v24  ;;  %v109_v11 = vld [vmem:[%s4510_s2 + $0x208] sm:$0xff]  ;;  %v108_v16 = vld [vmem:[%s4510_s2 + $0x200] sm:$0xff]  ;;  %v604_v18 = vcombine.high %v602_v10, %v602_v10  ;;  %v203_v19 = vld [vmem:[%s4510_s2 + $0x4f8] sm:$0xff] }
  0x2c   :  { %2256 = vmatprep.subr.mxu1 %v168_v25  ;;  %2222 = vmatpush3.msra.mxu0 %v120_v26  ;;  %v141_v12 = vld [vmem:[%s4510_s2 + $0x308] sm:$0xff]  ;;  %v140_v17 = vld [vmem:[%s4510_s2 + $0x300] sm:$0xff]  ;;  %v235_v20 = vld [vmem:[%s4510_s2 + $0x5f8] sm:$0xff] }
  0x2d   :  { %2257 = vmatpush3.msra.mxu1 %v152_v27  ;;  %2223 = vmatprep.subr.mxu0 %v135_v28  ;;  %v187_v21 = vld [vmem:[%s4510_s2 + $0x478] sm:$0xff]  ;;  %v202_v23 = vld [vmem:[%s4510_s2 + $0x4f0] sm:$0xff]  ;;  %v201_v27 = vld [vmem:[%s4510_s2 + $0x4e8] sm:$0xff] }
  0x2e   :  { %2258 = vmatprep.subr.mxu1 %v167_v29  ;;  %2224 = vmatpush3.msra.mxu0 %v119_v30  ;;  %v219_v22 = vld [vmem:[%s4510_s2 + $0x578] sm:$0xff]  ;;  %v234_v24 = vld [vmem:[%s4510_s2 + $0x5f0] sm:$0xff]  ;;  %v233_v28 = vld [vmem:[%s4510_s2 + $0x5e8] sm:$0xff] }
  0x2f   :  { %2259 = vmatpush3.msra.mxu1 %v151_v31  ;;  %2225 = vmatprep.subr.mxu0 %v134_v32  ;;  %v186_v25 = vld [vmem:[%s4510_s2 + $0x470] sm:$0xff]  ;;  %v185_v29 = vld [vmem:[%s4510_s2 + $0x468] sm:$0xff]  ;;  %v200_v31 = vld [vmem:[%s4510_s2 + $0x4e0] sm:$0xff] }
  0x30   :  { %2260 = vmatprep.subr.mxu1 %v166_v33  ;;  %2226 = vmatpush3.msra.mxu0 %v118_v34  ;;  %v218_v26 = vld [vmem:[%s4510_s2 + $0x570] sm:$0xff]  ;;  %v217_v30 = vld [vmem:[%s4510_s2 + $0x568] sm:$0xff]  ;;  %v232_v32 = vld [vmem:[%s4510_s2 + $0x5e0] sm:$0xff] }
  0x31   :  { %2261 = vmatpush3.msra.mxu1 %v150_v35  ;;  %2227 = vmatprep.subr.mxu0 %v133_v36  ;;  %v184_v33 = vld [vmem:[%s4510_s2 + $0x460] sm:$0xff]  ;;  %v199_v35 = vld [vmem:[%s4510_s2 + $0x4d8] sm:$0xff]  ;;  %v226_v57 = vld [vmem:[%s4510_s2 + $0x5b0] sm:$0xff] }
  0x32   :  { %2262 = vmatprep.subr.mxu1 %v165_v37  ;;  %2228 = vmatpush3.msra.mxu0 %v117_v38  ;;  %v216_v34 = vld [vmem:[%s4510_s2 + $0x560] sm:$0xff]  ;;  %v231_v36 = vld [vmem:[%s4510_s2 + $0x5d8] sm:$0xff]  ;;  %v38_v0 = vld [vmem:[%s4508_s0 + $0x10] sm:$0xff] }
  0x33   :  { %2263 = vmatpush3.msra.mxu1 %v149_v39  ;;  %2229 = vmatprep.subr.mxu0 %v132_v40  ;;  %v183_v37 = vld [vmem:[%s4510_s2 + $0x458] sm:$0xff]  ;;  %v198_v39 = vld [vmem:[%s4510_s2 + $0x4d0] sm:$0xff] }
  0x34   :  { %2264 = vmatprep.subr.mxu1 %v164_v41  ;;  %2230 = vmatpush3.msra.mxu0 %v116_v42  ;;  %v215_v38 = vld [vmem:[%s4510_s2 + $0x558] sm:$0xff]  ;;  %v230_v40 = vld [vmem:[%s4510_s2 + $0x5d0] sm:$0xff] }
  0x35   :  { %2265 = vmatpush3.msra.mxu1 %v148_v43  ;;  %2231 = vmatprep.subr.mxu0 %v131_v44  ;;  %v182_v41 = vld [vmem:[%s4510_s2 + $0x450] sm:$0xff]  ;;  %v197_v43 = vld [vmem:[%s4510_s2 + $0x4c8] sm:$0xff] }
  0x36   :  { %2266 = vmatprep.subr.mxu1 %v163_v45  ;;  %2232 = vmatpush3.msra.mxu0 %v115_v46  ;;  %v214_v42 = vld [vmem:[%s4510_s2 + $0x550] sm:$0xff]  ;;  %v229_v44 = vld [vmem:[%s4510_s2 + $0x5c8] sm:$0xff] }
  0x37   :  { %2267 = vmatpush3.msra.mxu1 %v147_v47  ;;  %2233 = vmatprep.subr.mxu0 %v130_v48  ;;  %v181_v45 = vld [vmem:[%s4510_s2 + $0x448] sm:$0xff]  ;;  %v196_v47 = vld [vmem:[%s4510_s2 + $0x4c0] sm:$0xff] }
  0x38   :  { %2268 = vmatprep.subr.mxu1 %v162_v49  ;;  %2234 = vmatpush3.msra.mxu0 %v114_v50  ;;  %v213_v46 = vld [vmem:[%s4510_s2 + $0x548] sm:$0xff]  ;;  %v228_v48 = vld [vmem:[%s4510_s2 + $0x5c0] sm:$0xff] }
  0x39   :  { %2269 = vmatpush3.msra.mxu1 %v146_v52  ;;  %2235 = vmatprep.subr.mxu0 %v129_v53  ;;  %v180_v49 = vld [vmem:[%s4510_s2 + $0x440] sm:$0xff]  ;;  %v195_v52 = vld [vmem:[%s4510_s2 + $0x4b8] sm:$0xff] }
  0x3a   :  { %2270 = vmatprep.subr.mxu1 %v161_v54  ;;  %2236 = vmatpush3.msra.mxu0 %v113_v55  ;;  %v212_v50 = vld [vmem:[%s4510_s2 + $0x540] sm:$0xff]  ;;  %v227_v53 = vld [vmem:[%s4510_s2 + $0x5b8] sm:$0xff] }
  0x3b   :  { %2271 = vmatpush3.msra.mxu1 %v145_v56  ;;  %2237 = vmatprep.subr.mxu0 %v128_v58  ;;  %v179_v54 = vld [vmem:[%s4510_s2 + $0x438] sm:$0xff]  ;;  %v194_v56 = vld [vmem:[%s4510_s2 + $0x4b0] sm:$0xff] }
  0x3c   :  { %2272 = vmatprep.subr.mxu1 %v160_v59  ;;  %2238 = vmatpush3.msra.mxu0 %v112_v60  ;;  %v211_v55 = vld [vmem:[%s4510_s2 + $0x538] sm:$0xff]  ;;  %v178_v58 = vld [vmem:[%s4510_s2 + $0x430] sm:$0xff]  ;;  %v193_v60 = vld [vmem:[%s4510_s2 + $0x4a8] sm:$0xff] }
  0x3d   :  { %2273 = vmatpush3.msra.mxu1 %v144_v61  ;;  %2239 = vmatprep.subr.mxu0 %v127_v62  ;;  %v210_v59 = vld [vmem:[%s4510_s2 + $0x530] sm:$0xff]  ;;  %v225_v61 = vld [vmem:[%s4510_s2 + $0x5a8] sm:$0xff] }
  0x3e   :  { %2274 = vmatprep.subr.mxu1 %v159_v63  ;;  %2240 = vmatpush3.msra.mxu0 %v111_v1  ;;  %v177_v62 = vld [vmem:[%s4510_s2 + $0x428] sm:$0xff]  ;;  %v192_v1 = vld [vmem:[%s4510_s2 + $0x4a0] sm:$0xff] }
  0x3f   :  { %2275 = vmatpush3.msra.mxu1 %v143_v2  ;;  %2241 = vmatprep.subr.mxu0 %v126_v3  ;;  %v209_v63 = vld [vmem:[%s4510_s2 + $0x528] sm:$0xff]  ;;  %v224_v2 = vld [vmem:[%s4510_s2 + $0x5a0] sm:$0xff] }
  0x40   :  { %2276 = vmatprep.subr.mxu1 %v158_v4  ;;  %2242 = vmatpush3.msra.mxu0 %v110_v6  ;;  %v176_v3 = vld [vmem:[%s4510_s2 + $0x420] sm:$0xff]  ;;  %v223_v6 = vld [vmem:[%s4510_s2 + $0x598] sm:$0xff] }
  0x41   :  { %2277 = vmatpush3.msra.mxu1 %v142_v7  ;;  %2243 = vmatprep.subr.mxu0 %v125_v8  ;;  %v208_v4 = vld [vmem:[%s4510_s2 + $0x520] sm:$0xff]  ;;  %v605_v7 = vcombine.high %v38_v0, %v38_v0  ;;  %v175_v8 = vld [vmem:[%s4510_s2 + $0x418] sm:$0xff] }
  0x42   :  { %2278 = vmatprep.subr.mxu1 %v157_v9  ;;  %2244 = vmatpush3.msra.mxu0 %v109_v11  ;;  %v207_v9 = vld [vmem:[%s4510_s2 + $0x518] sm:$0xff]  ;;  %v222_v11 = vld [vmem:[%s4510_s2 + $0x590] sm:$0xff] }
  0x43   :  { %2279 = vmatpush3.msra.mxu1 %v141_v12  ;;  %2245 = vmatprep.subr.mxu0 %v124_v13  ;;  %v612_v12 = vrot.slane %v38_v0, %v2989_v51  ;;  %v174_v13 = vld [vmem:[%s4510_s2 + $0x410] sm:$0xff] }
  0x44   :  { %2280 = vmatprep.subr.mxu1 %v156_v14  ;;  %2246 = vmatpush3.msra.mxu0 %v108_v16  ;;  %v206_v14 = vld [vmem:[%s4510_s2 + $0x510] sm:$0xff]  ;;  %v221_v16 = vld [vmem:[%s4510_s2 + $0x588] sm:$0xff] }
  0x45   :  { %943 = vmatprep.mubr.f32.mxu0 %v603_v15  ;;  %2281 = vmatpush3.msra.mxu1 %v140_v17  ;;  %v189_v15 = vld [vmem:[%s4510_s2 + $0x488] sm:$0xff]  ;;  %v619_v17 = vrot.slane %v605_v7, %v2989_v51  ;;  %v290_v0 = vld [vmem:[%s4510_s2 + $0x7b0] sm:$0xff]  ;;  %v39_v7 = vld [vmem:[%s4508_s0 + $0x18] sm:$0xff] }
  0x46   :  { %944 = vmatmul.mubr.f32.vlgmr.msra.gmra.mxu0 %v595_v5  ;;  %1013 = vmatprep.mubr.f32.mxu1 %v604_v18  ;;  %v191_v5 = vld [vmem:[%s4510_s2 + $0x498] sm:$0xff]  ;;  %v173_v18 = vld [vmem:[%s4510_s2 + $0x408] sm:$0xff] }
  0x47   :  { %2285 = vmatprep.subr.mxu0 %v203_v19  ;;  %2320 = vmatprep.subr.mxu1 %v235_v20  ;;  %v205_v19 = vld [vmem:[%s4510_s2 + $0x508] sm:$0xff]  ;;  %v188_v20 = vld [vmem:[%s4510_s2 + $0x480] sm:$0xff] }
  0x48   :  { %1014 = vmatmul.mubr.f32.vlgmr.msra.gmra.mxu1 %v602_v10  ;;  %2286 = vmatpush3.msra.mxu0 %v187_v21  ;;  %v190_v10 = vld [vmem:[%s4510_s2 + $0x490] sm:$0xff]  ;;  %v220_v21 = vld [vmem:[%s4510_s2 + $0x580] sm:$0xff] }
  0x49   :  { %2321 = vmatpush3.msra.mxu1 %v219_v22  ;;  %2287 = vmatprep.subr.mxu0 %v202_v23  ;;  %v620_v22 = vcombine.high %v612_v12, %v612_v12  ;;  %v172_v23 = vld [vmem:[%s4510_s2 + $0x400] sm:$0xff] }
  0x4a   :  { %2322 = vmatprep.subr.mxu1 %v234_v24  ;;  %2288 = vmatpush3.msra.mxu0 %v186_v25  ;;  %v204_v24 = vld [vmem:[%s4510_s2 + $0x500] sm:$0xff]  ;;  %v621_v25 = vcombine.high %v619_v17, %v619_v17 }
  0x4b   :  { %2323 = vmatpush3.msra.mxu1 %v218_v26  ;;  %2289 = vmatprep.subr.mxu0 %v201_v27  ;;  %v267_v26 = vld [vmem:[%s4510_s2 + $0x6f8] sm:$0xff] }
  0x4c   :  { %2324 = vmatprep.subr.mxu1 %v233_v28  ;;  %2290 = vmatpush3.msra.mxu0 %v185_v29  ;;  %v299_v27 = vld [vmem:[%s4510_s2 + $0x7f8] sm:$0xff] }
  0x4d   :  { %2325 = vmatpush3.msra.mxu1 %v217_v30  ;;  %2291 = vmatprep.subr.mxu0 %v200_v31  ;;  %v251_v28 = vld [vmem:[%s4510_s2 + $0x678] sm:$0xff]  ;;  %v266_v30 = vld [vmem:[%s4510_s2 + $0x6f0] sm:$0xff] }
  0x4e   :  { %2326 = vmatprep.subr.mxu1 %v232_v32  ;;  %2292 = vmatpush3.msra.mxu0 %v184_v33  ;;  %v283_v29 = vld [vmem:[%s4510_s2 + $0x778] sm:$0xff]  ;;  %v298_v31 = vld [vmem:[%s4510_s2 + $0x7f0] sm:$0xff] }
  0x4f   :  { %2327 = vmatpush3.msra.mxu1 %v216_v34  ;;  %2293 = vmatprep.subr.mxu0 %v199_v35  ;;  %v250_v32 = vld [vmem:[%s4510_s2 + $0x670] sm:$0xff]  ;;  %v265_v34 = vld [vmem:[%s4510_s2 + $0x6e8] sm:$0xff] }
  0x50   :  { %2328 = vmatprep.subr.mxu1 %v231_v36  ;;  %2294 = vmatpush3.msra.mxu0 %v183_v37  ;;  %v282_v33 = vld [vmem:[%s4510_s2 + $0x770] sm:$0xff]  ;;  %v297_v35 = vld [vmem:[%s4510_s2 + $0x7e8] sm:$0xff] }
  0x51   :  { %2329 = vmatpush3.msra.mxu1 %v215_v38  ;;  %2295 = vmatprep.subr.mxu0 %v198_v39  ;;  %v249_v36 = vld [vmem:[%s4510_s2 + $0x668] sm:$0xff]  ;;  %v264_v38 = vld [vmem:[%s4510_s2 + $0x6e0] sm:$0xff] }
  0x52   :  { %2330 = vmatprep.subr.mxu1 %v230_v40  ;;  %2296 = vmatpush3.msra.mxu0 %v182_v41  ;;  %v281_v37 = vld [vmem:[%s4510_s2 + $0x768] sm:$0xff]  ;;  %v296_v39 = vld [vmem:[%s4510_s2 + $0x7e0] sm:$0xff] }
  0x53   :  { %2331 = vmatpush3.msra.mxu1 %v214_v42  ;;  %2297 = vmatprep.subr.mxu0 %v197_v43  ;;  %v248_v40 = vld [vmem:[%s4510_s2 + $0x660] sm:$0xff]  ;;  %v263_v42 = vld [vmem:[%s4510_s2 + $0x6d8] sm:$0xff] }
  0x54   :  { %2332 = vmatprep.subr.mxu1 %v229_v44  ;;  %2298 = vmatpush3.msra.mxu0 %v181_v45  ;;  %v280_v41 = vld [vmem:[%s4510_s2 + $0x760] sm:$0xff]  ;;  %v295_v43 = vld [vmem:[%s4510_s2 + $0x7d8] sm:$0xff] }
  0x55   :  { %2333 = vmatpush3.msra.mxu1 %v213_v46  ;;  %2299 = vmatprep.subr.mxu0 %v196_v47  ;;  %v247_v44 = vld [vmem:[%s4510_s2 + $0x658] sm:$0xff]  ;;  %v262_v46 = vld [vmem:[%s4510_s2 + $0x6d0] sm:$0xff] }
  0x56   :  { %2334 = vmatprep.subr.mxu1 %v228_v48  ;;  %2300 = vmatpush3.msra.mxu0 %v180_v49  ;;  %v279_v45 = vld [vmem:[%s4510_s2 + $0x758] sm:$0xff]  ;;  %v294_v47 = vld [vmem:[%s4510_s2 + $0x7d0] sm:$0xff] }
  0x57   :  { %2335 = vmatpush3.msra.mxu1 %v212_v50  ;;  %2301 = vmatprep.subr.mxu0 %v195_v52  ;;  %v246_v48 = vld [vmem:[%s4510_s2 + $0x650] sm:$0xff]  ;;  %v261_v50 = vld [vmem:[%s4510_s2 + $0x6c8] sm:$0xff] }
  0x58   :  { %2336 = vmatprep.subr.mxu1 %v227_v53  ;;  %2302 = vmatpush3.msra.mxu0 %v179_v54  ;;  %v278_v49 = vld [vmem:[%s4510_s2 + $0x750] sm:$0xff]  ;;  %v293_v52 = vld [vmem:[%s4510_s2 + $0x7c8] sm:$0xff] }
  0x59   :  { %2337 = vmatpush3.msra.mxu1 %v211_v55  ;;  %2303 = vmatprep.subr.mxu0 %v194_v56  ;;  %v245_v53 = vld [vmem:[%s4510_s2 + $0x648] sm:$0xff]  ;;  %v260_v55 = vld [vmem:[%s4510_s2 + $0x6c0] sm:$0xff] }
  0x5a   :  { %2338 = vmatprep.subr.mxu1 %v226_v57  ;;  %2304 = vmatpush3.msra.mxu0 %v178_v58  ;;  %v277_v54 = vld [vmem:[%s4510_s2 + $0x748] sm:$0xff]  ;;  %v292_v56 = vld [vmem:[%s4510_s2 + $0x7c0] sm:$0xff] }
  0x5b   :  { %2339 = vmatpush3.msra.mxu1 %v210_v59  ;;  %2305 = vmatprep.subr.mxu0 %v193_v60  ;;  %v244_v57 = vld [vmem:[%s4510_s2 + $0x640] sm:$0xff]  ;;  %v259_v59 = vld [vmem:[%s4510_s2 + $0x6b8] sm:$0xff] }
  0x5c   :  { %2340 = vmatprep.subr.mxu1 %v225_v61  ;;  %2306 = vmatpush3.msra.mxu0 %v177_v62  ;;  %v276_v58 = vld [vmem:[%s4510_s2 + $0x740] sm:$0xff]  ;;  %v291_v60 = vld [vmem:[%s4510_s2 + $0x7b8] sm:$0xff] }
  0x5d   :  { %2341 = vmatpush3.msra.mxu1 %v209_v63  ;;  %2307 = vmatprep.subr.mxu0 %v192_v1  ;;  %v243_v61 = vld [vmem:[%s4510_s2 + $0x638] sm:$0xff]  ;;  %v258_v63 = vld [vmem:[%s4510_s2 + $0x6b0] sm:$0xff] }
  0x5e   :  { %2342 = vmatprep.subr.mxu1 %v224_v2  ;;  %2308 = vmatpush3.msra.mxu0 %v176_v3  ;;  %v275_v62 = vld [vmem:[%s4510_s2 + $0x738] sm:$0xff]  ;;  %v242_v1 = vld [vmem:[%s4510_s2 + $0x630] sm:$0xff]  ;;  %v257_v3 = vld [vmem:[%s4510_s2 + $0x6a8] sm:$0xff] }
  0x5f   :  { %2343 = vmatpush3.msra.mxu1 %v208_v4  ;;  %2309 = vmatprep.subr.mxu0 %v191_v5  ;;  %v274_v2 = vld [vmem:[%s4510_s2 + $0x730] sm:$0xff]  ;;  %v289_v4 = vld [vmem:[%s4510_s2 + $0x7a8] sm:$0xff] }
  0x60   :  { %2344 = vmatprep.subr.mxu1 %v223_v6  ;;  %2310 = vmatpush3.msra.mxu0 %v175_v8  ;;  %v241_v5 = vld [vmem:[%s4510_s2 + $0x628] sm:$0xff]  ;;  %v256_v8 = vld [vmem:[%s4510_s2 + $0x6a0] sm:$0xff] }
  0x61   :  { %2345 = vmatpush3.msra.mxu1 %v207_v9  ;;  %2311 = vmatprep.subr.mxu0 %v190_v10  ;;  %v273_v6 = vld [vmem:[%s4510_s2 + $0x728] sm:$0xff]  ;;  %v288_v9 = vld [vmem:[%s4510_s2 + $0x7a0] sm:$0xff] }
  0x62   :  { %2346 = vmatprep.subr.mxu1 %v222_v11  ;;  %2312 = vmatpush3.msra.mxu0 %v174_v13  ;;  %v240_v10 = vld [vmem:[%s4510_s2 + $0x620] sm:$0xff]  ;;  %v287_v13 = vld [vmem:[%s4510_s2 + $0x798] sm:$0xff] }
  0x63   :  { %2347 = vmatpush3.msra.mxu1 %v206_v14  ;;  %2313 = vmatprep.subr.mxu0 %v189_v15  ;;  %v272_v11 = vld [vmem:[%s4510_s2 + $0x720] sm:$0xff]  ;;  %v622_v14 = vcombine.high %v39_v7, %v39_v7  ;;  %v239_v15 = vld [vmem:[%s4510_s2 + $0x618] sm:$0xff] }
  0x64   :  { %2348 = vmatprep.subr.mxu1 %v221_v16  ;;  %2314 = vmatpush3.msra.mxu0 %v173_v18  ;;  %v271_v16 = vld [vmem:[%s4510_s2 + $0x718] sm:$0xff]  ;;  %v286_v18 = vld [vmem:[%s4510_s2 + $0x790] sm:$0xff] }
  0x65   :  { %2349 = vmatpush3.msra.mxu1 %v205_v19  ;;  %2315 = vmatprep.subr.mxu0 %v188_v20  ;;  %v629_v19 = vrot.slane %v39_v7, %v2989_v51  ;;  %v238_v20 = vld [vmem:[%s4510_s2 + $0x610] sm:$0xff] }
  0x66   :  { %2350 = vmatprep.subr.mxu1 %v220_v21  ;;  %2316 = vmatpush3.msra.mxu0 %v172_v23  ;;  %v270_v21 = vld [vmem:[%s4510_s2 + $0x710] sm:$0xff]  ;;  %v285_v23 = vld [vmem:[%s4510_s2 + $0x788] sm:$0xff] }
  0x67   :  { %1083 = vmatprep.mubr.f32.mxu0 %v620_v22  ;;  %2351 = vmatpush3.msra.mxu1 %v204_v24  ;;  %v253_v22 = vld [vmem:[%s4510_s2 + $0x688] sm:$0xff]  ;;  %v636_v24 = vrot.slane %v622_v14, %v2989_v51  ;;  %v354_v7 = vld [vmem:[%s4510_s2 + $0x9b0] sm:$0xff]  ;;  %v40_v14 = vld [vmem:[%s4508_s0 + $0x20] sm:$0xff] }
  0x68   :  { %1084 = vmatmul.mubr.f32.vlgmr.msra.gmra.mxu0 %v612_v12  ;;  %1153 = vmatprep.mubr.f32.mxu1 %v621_v25  ;;  %v255_v12 = vld [vmem:[%s4510_s2 + $0x698] sm:$0xff]  ;;  %v237_v25 = vld [vmem:[%s4510_s2 + $0x608] sm:$0xff] }
  0x69   :  { %2355 = vmatprep.subr.mxu0 %v267_v26  ;;  %2390 = vmatprep.subr.mxu1 %v299_v27  ;;  %v269_v26 = vld [vmem:[%s4510_s2 + $0x708] sm:$0xff]  ;;  %v252_v27 = vld [vmem:[%s4510_s2 + $0x680] sm:$0xff] }
  0x6a   :  { %1154 = vmatmul.mubr.f32.vlgmr.msra.gmra.mxu1 %v619_v17  ;;  %2356 = vmatpush3.msra.mxu0 %v251_v28  ;;  %v254_v17 = vld [vmem:[%s4510_s2 + $0x690] sm:$0xff]  ;;  %v284_v28 = vld [vmem:[%s4510_s2 + $0x780] sm:$0xff] }
  0x6b   :  { %2391 = vmatpush3.msra.mxu1 %v283_v29  ;;  %2357 = vmatprep.subr.mxu0 %v266_v30  ;;  %v637_v29 = vcombine.high %v629_v19, %v629_v19  ;;  %v236_v30 = vld [vmem:[%s4510_s2 + $0x600] sm:$0xff] }
  0x6c   :  { %2392 = vmatprep.subr.mxu1 %v298_v31  ;;  %2358 = vmatpush3.msra.mxu0 %v250_v32  ;;  %v268_v31 = vld [vmem:[%s4510_s2 + $0x700] sm:$0xff]  ;;  %v638_v32 = vcombine.high %v636_v24, %v636_v24 }
  0x6d   :  { %2393 = vmatpush3.msra.mxu1 %v282_v33  ;;  %2359 = vmatprep.subr.mxu0 %v265_v34  ;;  %v331_v33 = vld [vmem:[%s4510_s2 + $0x8f8] sm:$0xff] }
  0x6e   :  { %2394 = vmatprep.subr.mxu1 %v297_v35  ;;  %2360 = vmatpush3.msra.mxu0 %v249_v36  ;;  %v363_v34 = vld [vmem:[%s4510_s2 + $0x9f8] sm:$0xff] }
  0x6f   :  { %2395 = vmatpush3.msra.mxu1 %v281_v37  ;;  %2361 = vmatprep.subr.mxu0 %v264_v38  ;;  %v315_v35 = vld [vmem:[%s4510_s2 + $0x878] sm:$0xff]  ;;  %v330_v37 = vld [vmem:[%s4510_s2 + $0x8f0] sm:$0xff] }
  0x70   :  { %2396 = vmatprep.subr.mxu1 %v296_v39  ;;  %2362 = vmatpush3.msra.mxu0 %v248_v40  ;;  %v347_v36 = vld [vmem:[%s4510_s2 + $0x978] sm:$0xff]  ;;  %v362_v38 = vld [vmem:[%s4510_s2 + $0x9f0] sm:$0xff] }
  0x71   :  { %2397 = vmatpush3.msra.mxu1 %v280_v41  ;;  %2363 = vmatprep.subr.mxu0 %v263_v42  ;;  %v314_v39 = vld [vmem:[%s4510_s2 + $0x870] sm:$0xff]  ;;  %v329_v41 = vld [vmem:[%s4510_s2 + $0x8e8] sm:$0xff] }
  0x72   :  { %2398 = vmatprep.subr.mxu1 %v295_v43  ;;  %2364 = vmatpush3.msra.mxu0 %v247_v44  ;;  %v346_v40 = vld [vmem:[%s4510_s2 + $0x970] sm:$0xff]  ;;  %v361_v42 = vld [vmem:[%s4510_s2 + $0x9e8] sm:$0xff] }
  0x73   :  { %2399 = vmatpush3.msra.mxu1 %v279_v45  ;;  %2365 = vmatprep.subr.mxu0 %v262_v46  ;;  %v313_v43 = vld [vmem:[%s4510_s2 + $0x868] sm:$0xff]  ;;  %v328_v45 = vld [vmem:[%s4510_s2 + $0x8e0] sm:$0xff] }
  0x74   :  { %2400 = vmatprep.subr.mxu1 %v294_v47  ;;  %2366 = vmatpush3.msra.mxu0 %v246_v48  ;;  %v345_v44 = vld [vmem:[%s4510_s2 + $0x968] sm:$0xff]  ;;  %v360_v46 = vld [vmem:[%s4510_s2 + $0x9e0] sm:$0xff] }
  0x75   :  { %2401 = vmatpush3.msra.mxu1 %v278_v49  ;;  %2367 = vmatprep.subr.mxu0 %v261_v50  ;;  %v312_v47 = vld [vmem:[%s4510_s2 + $0x860] sm:$0xff]  ;;  %v327_v49 = vld [vmem:[%s4510_s2 + $0x8d8] sm:$0xff] }
  0x76   :  { %2402 = vmatprep.subr.mxu1 %v293_v52  ;;  %2368 = vmatpush3.msra.mxu0 %v245_v53  ;;  %v344_v48 = vld [vmem:[%s4510_s2 + $0x960] sm:$0xff]  ;;  %v359_v50 = vld [vmem:[%s4510_s2 + $0x9d8] sm:$0xff] }
  0x77   :  { %2403 = vmatpush3.msra.mxu1 %v277_v54  ;;  %2369 = vmatprep.subr.mxu0 %v260_v55  ;;  %v311_v52 = vld [vmem:[%s4510_s2 + $0x858] sm:$0xff]  ;;  %v326_v54 = vld [vmem:[%s4510_s2 + $0x8d0] sm:$0xff] }
  0x78   :  { %2404 = vmatprep.subr.mxu1 %v292_v56  ;;  %2370 = vmatpush3.msra.mxu0 %v244_v57  ;;  %v343_v53 = vld [vmem:[%s4510_s2 + $0x958] sm:$0xff]  ;;  %v358_v55 = vld [vmem:[%s4510_s2 + $0x9d0] sm:$0xff] }
  0x79   :  { %2405 = vmatpush3.msra.mxu1 %v276_v58  ;;  %2371 = vmatprep.subr.mxu0 %v259_v59  ;;  %v310_v56 = vld [vmem:[%s4510_s2 + $0x850] sm:$0xff]  ;;  %v325_v58 = vld [vmem:[%s4510_s2 + $0x8c8] sm:$0xff] }
  0x7a   :  { %2406 = vmatprep.subr.mxu1 %v291_v60  ;;  %2372 = vmatpush3.msra.mxu0 %v243_v61  ;;  %v342_v57 = vld [vmem:[%s4510_s2 + $0x950] sm:$0xff]  ;;  %v357_v59 = vld [vmem:[%s4510_s2 + $0x9c8] sm:$0xff] }
  0x7b   :  { %2407 = vmatpush3.msra.mxu1 %v275_v62  ;;  %2373 = vmatprep.subr.mxu0 %v258_v63  ;;  %v309_v60 = vld [vmem:[%s4510_s2 + $0x848] sm:$0xff]  ;;  %v324_v62 = vld [vmem:[%s4510_s2 + $0x8c0] sm:$0xff] }
  0x7c   :  { %2408 = vmatprep.subr.mxu1 %v290_v0  ;;  %2374 = vmatpush3.msra.mxu0 %v242_v1  ;;  %v341_v61 = vld [vmem:[%s4510_s2 + $0x948] sm:$0xff]  ;;  %v356_v63 = vld [vmem:[%s4510_s2 + $0x9c0] sm:$0xff] }
  0x7d   :  { %2409 = vmatpush3.msra.mxu1 %v274_v2  ;;  %2375 = vmatprep.subr.mxu0 %v257_v3  ;;  %v308_v0 = vld [vmem:[%s4510_s2 + $0x840] sm:$0xff]  ;;  %v323_v2 = vld [vmem:[%s4510_s2 + $0x8b8] sm:$0xff] }
  0x7e   :  { %2410 = vmatprep.subr.mxu1 %v289_v4  ;;  %2376 = vmatpush3.msra.mxu0 %v241_v5  ;;  %v340_v1 = vld [vmem:[%s4510_s2 + $0x940] sm:$0xff]  ;;  %v355_v3 = vld [vmem:[%s4510_s2 + $0x9b8] sm:$0xff] }
  0x7f   :  { %2411 = vmatpush3.msra.mxu1 %v273_v6  ;;  %2377 = vmatprep.subr.mxu0 %v256_v8  ;;  %v307_v4 = vld [vmem:[%s4510_s2 + $0x838] sm:$0xff]  ;;  %v322_v6 = vld [vmem:[%s4510_s2 + $0x8b0] sm:$0xff] }
  0x80   :  { %2412 = vmatprep.subr.mxu1 %v288_v9  ;;  %2378 = vmatpush3.msra.mxu0 %v240_v10  ;;  %v339_v5 = vld [vmem:[%s4510_s2 + $0x938] sm:$0xff]  ;;  %v306_v8 = vld [vmem:[%s4510_s2 + $0x830] sm:$0xff]  ;;  %v321_v10 = vld [vmem:[%s4510_s2 + $0x8a8] sm:$0xff] }
  0x81   :  { %2413 = vmatpush3.msra.mxu1 %v272_v11  ;;  %2379 = vmatprep.subr.mxu0 %v255_v12  ;;  %v338_v9 = vld [vmem:[%s4510_s2 + $0x930] sm:$0xff]  ;;  %v353_v11 = vld [vmem:[%s4510_s2 + $0x9a8] sm:$0xff] }
  0x82   :  { %2414 = vmatprep.subr.mxu1 %v287_v13  ;;  %2380 = vmatpush3.msra.mxu0 %v239_v15  ;;  %v305_v12 = vld [vmem:[%s4510_s2 + $0x828] sm:$0xff]  ;;  %v320_v15 = vld [vmem:[%s4510_s2 + $0x8a0] sm:$0xff] }
  0x83   :  { %2415 = vmatpush3.msra.mxu1 %v271_v16  ;;  %2381 = vmatprep.subr.mxu0 %v254_v17  ;;  %v337_v13 = vld [vmem:[%s4510_s2 + $0x928] sm:$0xff]  ;;  %v352_v16 = vld [vmem:[%s4510_s2 + $0x9a0] sm:$0xff] }
  0x84   :  { %2416 = vmatprep.subr.mxu1 %v286_v18  ;;  %2382 = vmatpush3.msra.mxu0 %v238_v20  ;;  %v304_v17 = vld [vmem:[%s4510_s2 + $0x820] sm:$0xff]  ;;  %v351_v20 = vld [vmem:[%s4510_s2 + $0x998] sm:$0xff] }
  0x85   :  { %2417 = vmatpush3.msra.mxu1 %v270_v21  ;;  %2383 = vmatprep.subr.mxu0 %v253_v22  ;;  %v336_v18 = vld [vmem:[%s4510_s2 + $0x920] sm:$0xff]  ;;  %v639_v21 = vcombine.high %v40_v14, %v40_v14  ;;  %v303_v22 = vld [vmem:[%s4510_s2 + $0x818] sm:$0xff] }
  0x86   :  { %2418 = vmatprep.subr.mxu1 %v285_v23  ;;  %2384 = vmatpush3.msra.mxu0 %v237_v25  ;;  %v335_v23 = vld [vmem:[%s4510_s2 + $0x918] sm:$0xff]  ;;  %v350_v25 = vld [vmem:[%s4510_s2 + $0x990] sm:$0xff] }
  0x87   :  { %2419 = vmatpush3.msra.mxu1 %v269_v26  ;;  %2385 = vmatprep.subr.mxu0 %v252_v27  ;;  %v646_v26 = vrot.slane %v40_v14, %v2989_v51  ;;  %v302_v27 = vld [vmem:[%s4510_s2 + $0x810] sm:$0xff] }
  0x88   :  { %2420 = vmatprep.subr.mxu1 %v284_v28  ;;  %2386 = vmatpush3.msra.mxu0 %v236_v30  ;;  %v334_v28 = vld [vmem:[%s4510_s2 + $0x910] sm:$0xff]  ;;  %v349_v30 = vld [vmem:[%s4510_s2 + $0x988] sm:$0xff] }
  0x89   :  { %1223 = vmatprep.mubr.f32.mxu0 %v637_v29  ;;  %2421 = vmatpush3.msra.mxu1 %v268_v31  ;;  %v317_v29 = vld [vmem:[%s4510_s2 + $0x888] sm:$0xff]  ;;  %v653_v31 = vrot.slane %v639_v21, %v2989_v51 }
  0x8a   :  { %1224 = vmatmul.mubr.f32.vlgmr.msra.gmra.mxu0 %v629_v19  ;;  %1293 = vmatprep.mubr.f32.mxu1 %v638_v32  ;;  %v319_v19 = vld [vmem:[%s4510_s2 + $0x898] sm:$0xff]  ;;  %v301_v32 = vld [vmem:[%s4510_s2 + $0x808] sm:$0xff] }
  0x8b   :  { %2425 = vmatprep.subr.mxu0 %v331_v33  ;;  %2460 = vmatprep.subr.mxu1 %v363_v34  ;;  %v333_v33 = vld [vmem:[%s4510_s2 + $0x908] sm:$0xff]  ;;  %v316_v34 = vld [vmem:[%s4510_s2 + $0x880] sm:$0xff] }
  0x8c   :  { %1294 = vmatmul.mubr.f32.vlgmr.msra.gmra.mxu1 %v636_v24  ;;  %2426 = vmatpush3.msra.mxu0 %v315_v35  ;;  %v318_v24 = vld [vmem:[%s4510_s2 + $0x890] sm:$0xff]  ;;  %v348_v35 = vld [vmem:[%s4510_s2 + $0x980] sm:$0xff] }
  0x8d   :  { %2461 = vmatpush3.msra.mxu1 %v347_v36  ;;  %2427 = vmatprep.subr.mxu0 %v330_v37  ;;  %v654_v36 = vcombine.high %v646_v26, %v646_v26  ;;  %v300_v37 = vld [vmem:[%s4510_s2 + $0x800] sm:$0xff] }
  0x8e   :  { %2462 = vmatprep.subr.mxu1 %v362_v38  ;;  %2428 = vmatpush3.msra.mxu0 %v314_v39  ;;  %v332_v38 = vld [vmem:[%s4510_s2 + $0x900] sm:$0xff]  ;;  %v655_v39 = vcombine.high %v653_v31, %v653_v31 }
  0x8f   :  { %2463 = vmatpush3.msra.mxu1 %v346_v40  ;;  %2429 = vmatprep.subr.mxu0 %v329_v41  ;;  %v395_v40 = vld [vmem:[%s4510_s2 + $0xaf8] sm:$0xff] }
  0x90   :  { %2464 = vmatprep.subr.mxu1 %v361_v42  ;;  %2430 = vmatpush3.msra.mxu0 %v313_v43  ;;  %v427_v41 = vld [vmem:[%s4510_s2 + $0xbf8] sm:$0xff] }
  0x91   :  { %2465 = vmatpush3.msra.mxu1 %v345_v44  ;;  %2431 = vmatprep.subr.mxu0 %v328_v45  ;;  %v379_v42 = vld [vmem:[%s4510_s2 + $0xa78] sm:$0xff]  ;;  %v394_v44 = vld [vmem:[%s4510_s2 + $0xaf0] sm:$0xff] }
  0x92   :  { %2466 = vmatprep.subr.mxu1 %v360_v46  ;;  %2432 = vmatpush3.msra.mxu0 %v312_v47  ;;  %v411_v43 = vld [vmem:[%s4510_s2 + $0xb78] sm:$0xff]  ;;  %v426_v45 = vld [vmem:[%s4510_s2 + $0xbf0] sm:$0xff] }
  0x93   :  { %2467 = vmatpush3.msra.mxu1 %v344_v48  ;;  %2433 = vmatprep.subr.mxu0 %v327_v49  ;;  %v378_v46 = vld [vmem:[%s4510_s2 + $0xa70] sm:$0xff]  ;;  %v393_v48 = vld [vmem:[%s4510_s2 + $0xae8] sm:$0xff] }
  0x94   :  { %2468 = vmatprep.subr.mxu1 %v359_v50  ;;  %2434 = vmatpush3.msra.mxu0 %v311_v52  ;;  %v410_v47 = vld [vmem:[%s4510_s2 + $0xb70] sm:$0xff]  ;;  %v425_v49 = vld [vmem:[%s4510_s2 + $0xbe8] sm:$0xff] }
  0x95   :  { %2469 = vmatpush3.msra.mxu1 %v343_v53  ;;  %2435 = vmatprep.subr.mxu0 %v326_v54  ;;  %v377_v50 = vld [vmem:[%s4510_s2 + $0xa68] sm:$0xff] }
  0x96   :  { %2470 = vmatprep.subr.mxu1 %v358_v55  ;;  %2436 = vmatpush3.msra.mxu0 %v310_v56  ;;  %v409_v52 = vld [vmem:[%s4510_s2 + $0xb68] sm:$0xff] }
  0x97   :  { %2471 = vmatpush3.msra.mxu1 %v342_v57  ;;  %2437 = vmatprep.subr.mxu0 %v325_v58 }
  0x98   :  { %2472 = vmatprep.subr.mxu1 %v357_v59  ;;  %2438 = vmatpush3.msra.mxu0 %v309_v60 }
  0x99   :  { %2473 = vmatpush3.msra.mxu1 %v341_v61  ;;  %2439 = vmatprep.subr.mxu0 %v324_v62 }
  0x9a   :  { %2474 = vmatprep.subr.mxu1 %v356_v63  ;;  %2440 = vmatpush3.msra.mxu0 %v308_v0 }
  0x9b   :  { %2475 = vmatpush3.msra.mxu1 %v340_v1  ;;  %2441 = vmatprep.subr.mxu0 %v323_v2 }
  0x9c   :  { %2476 = vmatprep.subr.mxu1 %v355_v3  ;;  %2442 = vmatpush3.msra.mxu0 %v307_v4 }
  0x9d   :  { %2477 = vmatpush3.msra.mxu1 %v339_v5  ;;  %2443 = vmatprep.subr.mxu0 %v322_v6 }
  0x9e   :  { %2478 = vmatprep.subr.mxu1 %v354_v7  ;;  %2444 = vmatpush3.msra.mxu0 %v306_v8 }
  0x9f   :  { %2479 = vmatpush3.msra.mxu1 %v338_v9  ;;  %2445 = vmatprep.subr.mxu0 %v321_v10 }
  0xa0   :  { %2480 = vmatprep.subr.mxu1 %v353_v11  ;;  %2446 = vmatpush3.msra.mxu0 %v305_v12 }
  0xa1   :  { %2481 = vmatpush3.msra.mxu1 %v337_v13  ;;  %2447 = vmatprep.subr.mxu0 %v320_v15 }
  0xa2   :  { %2482 = vmatprep.subr.mxu1 %v352_v16  ;;  %2448 = vmatpush3.msra.mxu0 %v304_v17 }
  0xa3   :  { %2483 = vmatpush3.msra.mxu1 %v336_v18  ;;  %2449 = vmatprep.subr.mxu0 %v319_v19 }
  0xa4   :  { %2484 = vmatprep.subr.mxu1 %v351_v20  ;;  %2450 = vmatpush3.msra.mxu0 %v303_v22 }
  0xa5   :  { %2485 = vmatpush3.msra.mxu1 %v335_v23  ;;  %2451 = vmatprep.subr.mxu0 %v318_v24 }
  0xa6   :  { %2486 = vmatprep.subr.mxu1 %v350_v25  ;;  %2452 = vmatpush3.msra.mxu0 %v302_v27 }
  0xa7   :  { %2487 = vmatpush3.msra.mxu1 %v334_v28  ;;  %2453 = vmatprep.subr.mxu0 %v317_v29 }
  0xa8   :  { %2488 = vmatprep.subr.mxu1 %v349_v30  ;;  %2454 = vmatpush3.msra.mxu0 %v301_v32 }
  0xa9   :  { %2489 = vmatpush3.msra.mxu1 %v333_v33  ;;  %2455 = vmatprep.subr.mxu0 %v316_v34 }
  0xaa   :  { %2490 = vmatprep.subr.mxu1 %v348_v35  ;;  %2456 = vmatpush3.msra.mxu0 %v300_v37 }
  0xab   :  { %1363 = vmatprep.mubr.f32.mxu0 %v654_v36  ;;  %2491 = vmatpush3.msra.mxu1 %v332_v38 }
  0xac   :  { %1364 = vmatmul.mubr.f32.vlgmr.msra.gmra.mxu0 %v646_v26  ;;  %1433 = vmatprep.mubr.f32.mxu1 %v655_v39 }
  0xad   :  { %2495 = vmatprep.subr.mxu0 %v395_v40  ;;  %2530 = vmatprep.subr.mxu1 %v427_v41 }
  0xae   :  { %1434 = vmatmul.mubr.f32.vlgmr.msra.gmra.mxu1 %v653_v31  ;;  %2496 = vmatpush3.msra.mxu0 %v379_v42 }
  0xaf   :  { %2531 = vmatpush3.msra.mxu1 %v411_v43  ;;  %2497 = vmatprep.subr.mxu0 %v394_v44 }
  0xb0   :  { %2532 = vmatprep.subr.mxu1 %v426_v45 }
  0xb1   :  { %15 = vsyncpa [#allocation3], 0  ;;  %2498 = vmatpush3.msra.mxu0 %v378_v46  ;;  %2533 = vmatpush3.msra.mxu1 %v410_v47  ;;  %v392_v53 = vld [vmem:[%s4510_s2 + $0xae0] sm:$0xff]  ;;  %v391_v57 = vld [vmem:[%s4510_s2 + $0xad8] sm:$0xff]  ;;  %s2792_s13 = smov 32   ;;  %vm2794_vm0 = vmmov 0  }
  0xb2   :  { %v424_v54 = vld [vmem:[%s4510_s2 + $0xbe0] sm:$0xff]  ;;  %2499 = vmatprep.subr.mxu0 %v393_v48  ;;  %2534 = vmatprep.subr.mxu1 %v425_v49  ;;  %v423_v58 = vld [vmem:[%s4510_s2 + $0xbd8] sm:$0xff]  ;;  %v390_v61 = vld [vmem:[%s4510_s2 + $0xad0] sm:$0xff]  ;;  %vm1864_vm1 = vcmask 261120   ;;  %vm1878_vm2 = vcmask 326656   ;;  %s2795_s18 = smov [#allocation2]  }
  0xb3   :  { %v376_v55 = vld [vmem:[%s4510_s2 + $0xa60] sm:$0xff]  ;;  %2500 = vmatpush3.msra.mxu0 %v377_v50  ;;  %2535 = vmatpush3.msra.mxu1 %v409_v52  ;;  %v375_v59 = vld [vmem:[%s4510_s2 + $0xa58] sm:$0xff]  ;;  %v422_v62 = vld [vmem:[%s4510_s2 + $0xbd0] sm:$0xff]  ;;  %s2130_s19 = sshll.u32 %s2795_s18, 4  ;;  %vm2122_vm3 = vcmask 254976   ;;  %s2131_s19 = int_to_ptr.vmem [resolvable:$true] %s2130_s19 }
  0xb4   :  { %v408_v56 = vld [vmem:[%s4510_s2 + $0xb60] sm:$0xff]  ;;  %2501 = vmatprep.subr.mxu0 %v392_v53  ;;  %2536 = vmatprep.subr.mxu1 %v424_v54  ;;  %v407_v60 = vld [vmem:[%s4510_s2 + $0xb58] sm:$0xff]  ;;  %v374_v63 = vld [vmem:[%s4510_s2 + $0xa50] sm:$0xff]  ;;  %p2774_p1 = scmp.lt.s32.totalorder %s2131_s19, %s2131_s19 }
  0xb5   :  { %2502 = vmatpush3.msra.mxu0 %v376_v55  ;;  %2537 = vmatpush3.msra.mxu1 %v408_v56  ;;  %v406_v0 = vld [vmem:[%s4510_s2 + $0xb50] sm:$0xff]  ;;  %v389_v1 = vld [vmem:[%s4510_s2 + $0xac8] sm:$0xff]  ;;  %v388_v5 = vld [vmem:[%s4510_s2 + $0xac0] sm:$0xff] }
  0xb6   :  { %2503 = vmatprep.subr.mxu0 %v391_v57  ;;  %2538 = vmatprep.subr.mxu1 %v423_v58  ;;  %v421_v2 = vld [vmem:[%s4510_s2 + $0xbc8] sm:$0xff]  ;;  %v420_v6 = vld [vmem:[%s4510_s2 + $0xbc0] sm:$0xff]  ;;  %v387_v9 = vld [vmem:[%s4510_s2 + $0xab8] sm:$0xff] }
  0xb7   :  { %2504 = vmatpush3.msra.mxu0 %v375_v59  ;;  %2539 = vmatpush3.msra.mxu1 %v407_v60  ;;  %v373_v3 = vld [vmem:[%s4510_s2 + $0xa48] sm:$0xff]  ;;  %v372_v7 = vld [vmem:[%s4510_s2 + $0xa40] sm:$0xff]  ;;  %v419_v10 = vld [vmem:[%s4510_s2 + $0xbb8] sm:$0xff] }
  0xb8   :  { %2505 = vmatprep.subr.mxu0 %v390_v61  ;;  %2540 = vmatprep.subr.mxu1 %v422_v62  ;;  %v405_v4 = vld [vmem:[%s4510_s2 + $0xb48] sm:$0xff]  ;;  %v404_v8 = vld [vmem:[%s4510_s2 + $0xb40] sm:$0xff]  ;;  %v371_v11 = vld [vmem:[%s4510_s2 + $0xa38] sm:$0xff] }
  0xb9   :  { %2506 = vmatpush3.msra.mxu0 %v374_v63  ;;  %2541 = vmatpush3.msra.mxu1 %v406_v0  ;;  %v403_v12 = vld [vmem:[%s4510_s2 + $0xb38] sm:$0xff]  ;;  %v386_v13 = vld [vmem:[%s4510_s2 + $0xab0] sm:$0xff]  ;;  %v385_v17 = vld [vmem:[%s4510_s2 + $0xaa8] sm:$0xff] }
  0xba   :  { %2507 = vmatprep.subr.mxu0 %v389_v1  ;;  %2542 = vmatprep.subr.mxu1 %v421_v2  ;;  %v418_v14 = vld [vmem:[%s4510_s2 + $0xbb0] sm:$0xff]  ;;  %v417_v18 = vld [vmem:[%s4510_s2 + $0xba8] sm:$0xff]  ;;  %v384_v22 = vld [vmem:[%s4510_s2 + $0xaa0] sm:$0xff] }
  0xbb   :  { %2508 = vmatpush3.msra.mxu0 %v373_v3  ;;  %2543 = vmatpush3.msra.mxu1 %v405_v4  ;;  %v370_v15 = vld [vmem:[%s4510_s2 + $0xa30] sm:$0xff]  ;;  %v369_v19 = vld [vmem:[%s4510_s2 + $0xa28] sm:$0xff]  ;;  %v416_v23 = vld [vmem:[%s4510_s2 + $0xba0] sm:$0xff] }
  0xbc   :  { %2509 = vmatprep.subr.mxu0 %v388_v5  ;;  %2544 = vmatprep.subr.mxu1 %v420_v6  ;;  %v402_v16 = vld [vmem:[%s4510_s2 + $0xb30] sm:$0xff]  ;;  %v401_v20 = vld [vmem:[%s4510_s2 + $0xb28] sm:$0xff]  ;;  %v368_v24 = vld [vmem:[%s4510_s2 + $0xa20] sm:$0xff] }
  0xbd   :  { %2510 = vmatpush3.msra.mxu0 %v372_v7  ;;  %2545 = vmatpush3.msra.mxu1 %v404_v8  ;;  %v41_v21 = vld [vmem:[%s4508_s0 + $0x28] sm:$0xff]  ;;  %v400_v25 = vld [vmem:[%s4510_s2 + $0xb20] sm:$0xff]  ;;  %v383_v26 = vld [vmem:[%s4510_s2 + $0xa98] sm:$0xff] }
  0xbe   :  { %2511 = vmatprep.subr.mxu0 %v387_v9  ;;  %2546 = vmatprep.subr.mxu1 %v419_v10  ;;  %v415_v27 = vld [vmem:[%s4510_s2 + $0xb98] sm:$0xff]  ;;  %v656_v28 = vcombine.high %v41_v21, %v41_v21  ;;  %v382_v31 = vld [vmem:[%s4510_s2 + $0xa90] sm:$0xff]  ;;  %v663_v33 = vrot.slane %v41_v21, %v2989_v51  ;;  %v381_v36 = vld [vmem:[%s4510_s2 + $0xa88] sm:$0xff] }
  0xbf   :  { %2512 = vmatpush3.msra.mxu0 %v371_v11  ;;  %2547 = vmatpush3.msra.mxu1 %v403_v12  ;;  %v367_v29 = vld [vmem:[%s4510_s2 + $0xa18] sm:$0xff]  ;;  %v414_v32 = vld [vmem:[%s4510_s2 + $0xb90] sm:$0xff]  ;;  %v413_v37 = vld [vmem:[%s4510_s2 + $0xb88] sm:$0xff] }
  0xc0   :  { %2513 = vmatprep.subr.mxu0 %v386_v13  ;;  %2548 = vmatprep.subr.mxu1 %v418_v14  ;;  %v399_v30 = vld [vmem:[%s4510_s2 + $0xb18] sm:$0xff]  ;;  %v366_v34 = vld [vmem:[%s4510_s2 + $0xa10] sm:$0xff]  ;;  %v670_v38 = vrot.slane %v656_v28, %v2989_v51  ;;  %v365_v39 = vld [vmem:[%s4510_s2 + $0xa08] sm:$0xff]  ;;  %v671_v43 = vcombine.high %v663_v33, %v663_v33 }
  0xc1   :  { %2514 = vmatpush3.msra.mxu0 %v370_v15  ;;  %2549 = vmatpush3.msra.mxu1 %v402_v16  ;;  %v398_v35 = vld [vmem:[%s4510_s2 + $0xb10] sm:$0xff]  ;;  %v397_v40 = vld [vmem:[%s4510_s2 + $0xb08] sm:$0xff]  ;;  %v380_v41 = vld [vmem:[%s4510_s2 + $0xa80] sm:$0xff] }
  0xc2   :  { %2515 = vmatprep.subr.mxu0 %v385_v17  ;;  %2550 = vmatprep.subr.mxu1 %v417_v18  ;;  %v412_v42 = vld [vmem:[%s4510_s2 + $0xb80] sm:$0xff]  ;;  %v672_v46 = vcombine.high %v670_v38, %v670_v38  ;;  %v459_v47 = vld [vmem:[%s4510_s2 + $0xcf8] sm:$0xff]  ;;  %v458_v52 = vld [vmem:[%s4510_s2 + $0xcf0] sm:$0xff] }
  0xc3   :  { %2516 = vmatpush3.msra.mxu0 %v369_v19  ;;  %2551 = vmatpush3.msra.mxu1 %v401_v20  ;;  %v364_v44 = vld [vmem:[%s4510_s2 + $0xa00] sm:$0xff]  ;;  %v491_v48 = vld [vmem:[%s4510_s2 + $0xdf8] sm:$0xff]  ;;  %v490_v53 = vld [vmem:[%s4510_s2 + $0xdf0] sm:$0xff] }
  0xc4   :  { %2517 = vmatprep.subr.mxu0 %v384_v22  ;;  %2552 = vmatprep.subr.mxu1 %v416_v23  ;;  %v396_v45 = vld [vmem:[%s4510_s2 + $0xb00] sm:$0xff]  ;;  %v443_v49 = vld [vmem:[%s4510_s2 + $0xc78] sm:$0xff]  ;;  %v442_v54 = vld [vmem:[%s4510_s2 + $0xc70] sm:$0xff] }
  0xc5   :  { %2518 = vmatpush3.msra.mxu0 %v368_v24  ;;  %2553 = vmatpush3.msra.mxu1 %v400_v25  ;;  %v475_v50 = vld [vmem:[%s4510_s2 + $0xd78] sm:$0xff]  ;;  %v474_v55 = vld [vmem:[%s4510_s2 + $0xd70] sm:$0xff]  ;;  %v457_v56 = vld [vmem:[%s4510_s2 + $0xce8] sm:$0xff] }
  0xc6   :  { %2519 = vmatprep.subr.mxu0 %v383_v26  ;;  %2554 = vmatprep.subr.mxu1 %v415_v27  ;;  %v489_v57 = vld [vmem:[%s4510_s2 + $0xde8] sm:$0xff]  ;;  %v456_v60 = vld [vmem:[%s4510_s2 + $0xce0] sm:$0xff]  ;;  %v455_v0 = vld [vmem:[%s4510_s2 + $0xcd8] sm:$0xff] }
  0xc7   :  { %2520 = vmatpush3.msra.mxu0 %v367_v29  ;;  %2555 = vmatpush3.msra.mxu1 %v399_v30  ;;  %v441_v58 = vld [vmem:[%s4510_s2 + $0xc68] sm:$0xff]  ;;  %v488_v61 = vld [vmem:[%s4510_s2 + $0xde0] sm:$0xff]  ;;  %v487_v1 = vld [vmem:[%s4510_s2 + $0xdd8] sm:$0xff] }
  0xc8   :  { %2521 = vmatprep.subr.mxu0 %v382_v31  ;;  %2556 = vmatprep.subr.mxu1 %v414_v32  ;;  %v473_v59 = vld [vmem:[%s4510_s2 + $0xd68] sm:$0xff]  ;;  %v440_v62 = vld [vmem:[%s4510_s2 + $0xc60] sm:$0xff]  ;;  %v439_v2 = vld [vmem:[%s4510_s2 + $0xc58] sm:$0xff] }
  0xc9   :  { %2522 = vmatpush3.msra.mxu0 %v366_v34  ;;  %2557 = vmatpush3.msra.mxu1 %v398_v35  ;;  %v472_v63 = vld [vmem:[%s4510_s2 + $0xd60] sm:$0xff]  ;;  %v471_v3 = vld [vmem:[%s4510_s2 + $0xd58] sm:$0xff]  ;;  %v454_v4 = vld [vmem:[%s4510_s2 + $0xcd0] sm:$0xff] }
  0xca   :  { %2523 = vmatprep.subr.mxu0 %v381_v36  ;;  %2558 = vmatprep.subr.mxu1 %v413_v37  ;;  %v486_v5 = vld [vmem:[%s4510_s2 + $0xdd0] sm:$0xff]  ;;  %v453_v8 = vld [vmem:[%s4510_s2 + $0xcc8] sm:$0xff]  ;;  %v452_v12 = vld [vmem:[%s4510_s2 + $0xcc0] sm:$0xff] }
  0xcb   :  { %2524 = vmatpush3.msra.mxu0 %v365_v39  ;;  %2559 = vmatpush3.msra.mxu1 %v397_v40  ;;  %v438_v6 = vld [vmem:[%s4510_s2 + $0xc50] sm:$0xff]  ;;  %v485_v9 = vld [vmem:[%s4510_s2 + $0xdc8] sm:$0xff]  ;;  %v484_v13 = vld [vmem:[%s4510_s2 + $0xdc0] sm:$0xff] }
  0xcc   :  { %2525 = vmatprep.subr.mxu0 %v380_v41  ;;  %2560 = vmatprep.subr.mxu1 %v412_v42  ;;  %v470_v7 = vld [vmem:[%s4510_s2 + $0xd50] sm:$0xff]  ;;  %v437_v10 = vld [vmem:[%s4510_s2 + $0xc48] sm:$0xff]  ;;  %v436_v14 = vld [vmem:[%s4510_s2 + $0xc40] sm:$0xff] }
  0xcd   :  { %2526 = vmatpush3.msra.mxu0 %v364_v44  ;;  %1503 = vmatprep.mubr.f32.mxu0 %v671_v43  ;;  %v469_v11 = vld [vmem:[%s4510_s2 + $0xd48] sm:$0xff]  ;;  %v468_v15 = vld [vmem:[%s4510_s2 + $0xd40] sm:$0xff]  ;;  %v451_v16 = vld [vmem:[%s4510_s2 + $0xcb8] sm:$0xff] }
  0xce   :  { %2561 = vmatpush3.msra.mxu1 %v396_v45  ;;  %1504 = vmatmul.mubr.f32.vlgmr.msra.gmra.mxu0 %v663_v33  ;;  %v483_v17 = vld [vmem:[%s4510_s2 + $0xdb8] sm:$0xff]  ;;  %v450_v20 = vld [vmem:[%s4510_s2 + $0xcb0] sm:$0xff]  ;;  %v449_v24 = vld [vmem:[%s4510_s2 + $0xca8] sm:$0xff] }
  0xcf   :  { %1573 = vmatprep.mubr.f32.mxu1 %v672_v46  ;;  %2565 = vmatprep.subr.mxu0 %v459_v47  ;;  %v435_v18 = vld [vmem:[%s4510_s2 + $0xc38] sm:$0xff]  ;;  %v482_v21 = vld [vmem:[%s4510_s2 + $0xdb0] sm:$0xff]  ;;  %v481_v25 = vld [vmem:[%s4510_s2 + $0xda8] sm:$0xff] }
  0xd0   :  { %2600 = vmatprep.subr.mxu1 %v491_v48  ;;  %1574 = vmatmul.mubr.f32.vlgmr.msra.gmra.mxu1 %v670_v38  ;;  %v467_v19 = vld [vmem:[%s4510_s2 + $0xd38] sm:$0xff]  ;;  %v434_v22 = vld [vmem:[%s4510_s2 + $0xc30] sm:$0xff]  ;;  %v433_v26 = vld [vmem:[%s4510_s2 + $0xc28] sm:$0xff] }
  0xd1   :  { %2566 = vmatpush3.msra.mxu0 %v443_v49  ;;  %2601 = vmatpush3.msra.mxu1 %v475_v50  ;;  %v466_v23 = vld [vmem:[%s4510_s2 + $0xd30] sm:$0xff]  ;;  %v465_v27 = vld [vmem:[%s4510_s2 + $0xd28] sm:$0xff]  ;;  %v448_v29 = vld [vmem:[%s4510_s2 + $0xca0] sm:$0xff] }
  0xd2   :  { %2567 = vmatprep.subr.mxu0 %v458_v52  ;;  %2602 = vmatprep.subr.mxu1 %v490_v53  ;;  %v42_v28 = vld [vmem:[%s4508_s0 + $0x30] sm:$0xff]  ;;  %v480_v30 = vld [vmem:[%s4510_s2 + $0xda0] sm:$0xff]  ;;  %v447_v33 = vld [vmem:[%s4510_s2 + $0xc98] sm:$0xff] }
  0xd3   :  { %2568 = vmatpush3.msra.mxu0 %v442_v54  ;;  %2603 = vmatpush3.msra.mxu1 %v474_v55  ;;  %v432_v31 = vld [vmem:[%s4510_s2 + $0xc20] sm:$0xff]  ;;  %v479_v34 = vld [vmem:[%s4510_s2 + $0xd98] sm:$0xff]  ;;  %v673_v35 = vcombine.high %v42_v28, %v42_v28  ;;  %v446_v38 = vld [vmem:[%s4510_s2 + $0xc90] sm:$0xff]  ;;  %v680_v40 = vrot.slane %v42_v28, %v2989_v51 }
  0xd4   :  { %2569 = vmatprep.subr.mxu0 %v457_v56  ;;  %2604 = vmatprep.subr.mxu1 %v489_v57  ;;  %v464_v32 = vld [vmem:[%s4510_s2 + $0xd20] sm:$0xff]  ;;  %v431_v36 = vld [vmem:[%s4510_s2 + $0xc18] sm:$0xff]  ;;  %v478_v39 = vld [vmem:[%s4510_s2 + $0xd90] sm:$0xff] }
  0xd5   :  { %2570 = vmatpush3.msra.mxu0 %v441_v58  ;;  %2605 = vmatpush3.msra.mxu1 %v473_v59  ;;  %v463_v37 = vld [vmem:[%s4510_s2 + $0xd18] sm:$0xff]  ;;  %v430_v41 = vld [vmem:[%s4510_s2 + $0xc10] sm:$0xff]  ;;  %v445_v43 = vld [vmem:[%s4510_s2 + $0xc88] sm:$0xff]  ;;  %v687_v45 = vrot.slane %v673_v35, %v2989_v51  ;;  %v688_v50 = vcombine.high %v680_v40, %v680_v40 }
  0xd6   :  { %2571 = vmatprep.subr.mxu0 %v456_v60  ;;  %2606 = vmatprep.subr.mxu1 %v488_v61  ;;  %v462_v42 = vld [vmem:[%s4510_s2 + $0xd10] sm:$0xff]  ;;  %v477_v44 = vld [vmem:[%s4510_s2 + $0xd88] sm:$0xff]  ;;  %v444_v48 = vld [vmem:[%s4510_s2 + $0xc80] sm:$0xff] }
  0xd7   :  { %2572 = vmatpush3.msra.mxu0 %v440_v62  ;;  %2607 = vmatpush3.msra.mxu1 %v472_v63  ;;  %v429_v46 = vld [vmem:[%s4510_s2 + $0xc08] sm:$0xff]  ;;  %v476_v49 = vld [vmem:[%s4510_s2 + $0xd80] sm:$0xff]  ;;  %v689_v54 = vcombine.high %v687_v45, %v687_v45  ;;  %v523_v55 = vld [vmem:[%s4510_s2 + $0xef8] sm:$0xff] }
  0xd8   :  { %2573 = vmatprep.subr.mxu0 %v455_v0  ;;  %2608 = vmatprep.subr.mxu1 %v487_v1  ;;  %v461_v47 = vld [vmem:[%s4510_s2 + $0xd08] sm:$0xff]  ;;  %v428_v52 = vld [vmem:[%s4510_s2 + $0xc00] sm:$0xff]  ;;  %v555_v56 = vld [vmem:[%s4510_s2 + $0xff8] sm:$0xff] }
  0xd9   :  { %2574 = vmatpush3.msra.mxu0 %v439_v2  ;;  %2609 = vmatpush3.msra.mxu1 %v471_v3  ;;  %v460_v53 = vld [vmem:[%s4510_s2 + $0xd00] sm:$0xff]  ;;  %v507_v57 = vld [vmem:[%s4510_s2 + $0xe78] sm:$0xff]  ;;  %v522_v59 = vld [vmem:[%s4510_s2 + $0xef0] sm:$0xff] }
  0xda   :  { %2575 = vmatprep.subr.mxu0 %v454_v4  ;;  %2610 = vmatprep.subr.mxu1 %v486_v5  ;;  %v539_v58 = vld [vmem:[%s4510_s2 + $0xf78] sm:$0xff]  ;;  %v554_v60 = vld [vmem:[%s4510_s2 + $0xff0] sm:$0xff]  ;;  %v521_v63 = vld [vmem:[%s4510_s2 + $0xee8] sm:$0xff] }
  0xdb   :  { %2576 = vmatpush3.msra.mxu0 %v438_v6  ;;  %2611 = vmatpush3.msra.mxu1 %v470_v7  ;;  %v506_v61 = vld [vmem:[%s4510_s2 + $0xe70] sm:$0xff]  ;;  %v553_v0 = vld [vmem:[%s4510_s2 + $0xfe8] sm:$0xff]  ;;  %v520_v3 = vld [vmem:[%s4510_s2 + $0xee0] sm:$0xff] }
  0xdc   :  { %2577 = vmatprep.subr.mxu0 %v453_v8  ;;  %2612 = vmatprep.subr.mxu1 %v485_v9  ;;  %v538_v62 = vld [vmem:[%s4510_s2 + $0xf70] sm:$0xff]  ;;  %v505_v1 = vld [vmem:[%s4510_s2 + $0xe68] sm:$0xff]  ;;  %v552_v4 = vld [vmem:[%s4510_s2 + $0xfe0] sm:$0xff] }
  0xdd   :  { %2578 = vmatpush3.msra.mxu0 %v437_v10  ;;  %2613 = vmatpush3.msra.mxu1 %v469_v11  ;;  %v537_v2 = vld [vmem:[%s4510_s2 + $0xf68] sm:$0xff]  ;;  %v504_v5 = vld [vmem:[%s4510_s2 + $0xe60] sm:$0xff]  ;;  %v519_v7 = vld [vmem:[%s4510_s2 + $0xed8] sm:$0xff] }
  0xde   :  { %2579 = vmatprep.subr.mxu0 %v452_v12  ;;  %2614 = vmatprep.subr.mxu1 %v484_v13  ;;  %v536_v6 = vld [vmem:[%s4510_s2 + $0xf60] sm:$0xff]  ;;  %v551_v8 = vld [vmem:[%s4510_s2 + $0xfd8] sm:$0xff]  ;;  %v518_v11 = vld [vmem:[%s4510_s2 + $0xed0] sm:$0xff] }
  0xdf   :  { %2580 = vmatpush3.msra.mxu0 %v436_v14  ;;  %2615 = vmatpush3.msra.mxu1 %v468_v15  ;;  %v503_v9 = vld [vmem:[%s4510_s2 + $0xe58] sm:$0xff]  ;;  %v550_v12 = vld [vmem:[%s4510_s2 + $0xfd0] sm:$0xff]  ;;  %v517_v15 = vld [vmem:[%s4510_s2 + $0xec8] sm:$0xff] }
  0xe0   :  { %2581 = vmatprep.subr.mxu0 %v451_v16  ;;  %2616 = vmatprep.subr.mxu1 %v483_v17  ;;  %v535_v10 = vld [vmem:[%s4510_s2 + $0xf58] sm:$0xff]  ;;  %v502_v13 = vld [vmem:[%s4510_s2 + $0xe50] sm:$0xff]  ;;  %v549_v16 = vld [vmem:[%s4510_s2 + $0xfc8] sm:$0xff] }
  0xe1   :  { %2582 = vmatpush3.msra.mxu0 %v435_v18  ;;  %2617 = vmatpush3.msra.mxu1 %v467_v19  ;;  %v534_v14 = vld [vmem:[%s4510_s2 + $0xf50] sm:$0xff]  ;;  %v501_v17 = vld [vmem:[%s4510_s2 + $0xe48] sm:$0xff]  ;;  %v516_v19 = vld [vmem:[%s4510_s2 + $0xec0] sm:$0xff] }
  0xe2   :  { %2583 = vmatprep.subr.mxu0 %v450_v20  ;;  %2618 = vmatprep.subr.mxu1 %v482_v21  ;;  %v533_v18 = vld [vmem:[%s4510_s2 + $0xf48] sm:$0xff]  ;;  %v548_v20 = vld [vmem:[%s4510_s2 + $0xfc0] sm:$0xff]  ;;  %v546_v28 = vld [vmem:[%s4510_s2 + $0xfb0] sm:$0xff] }
  0xe3   :  { %2584 = vmatpush3.msra.mxu0 %v434_v22  ;;  %2619 = vmatpush3.msra.mxu1 %v466_v23  ;;  %v500_v21 = vld [vmem:[%s4510_s2 + $0xe40] sm:$0xff]  ;;  %v515_v23 = vld [vmem:[%s4510_s2 + $0xeb8] sm:$0xff]  ;;  %v529_v35 = vld [vmem:[%s4510_s2 + $0xf28] sm:$0xff] }
  0xe4   :  { %2585 = vmatprep.subr.mxu0 %v449_v24  ;;  %2620 = vmatprep.subr.mxu1 %v481_v25  ;;  %v532_v22 = vld [vmem:[%s4510_s2 + $0xf40] sm:$0xff]  ;;  %v547_v24 = vld [vmem:[%s4510_s2 + $0xfb8] sm:$0xff] }
  0xe5   :  { %2586 = vmatpush3.msra.mxu0 %v433_v26  ;;  %2621 = vmatpush3.msra.mxu1 %v465_v27  ;;  %v499_v25 = vld [vmem:[%s4510_s2 + $0xe38] sm:$0xff]  ;;  %v514_v27 = vld [vmem:[%s4510_s2 + $0xeb0] sm:$0xff] }
  0xe6   :  { %2587 = vmatprep.subr.mxu0 %v448_v29  ;;  %2622 = vmatprep.subr.mxu1 %v480_v30  ;;  %v531_v26 = vld [vmem:[%s4510_s2 + $0xf38] sm:$0xff]  ;;  %v498_v29 = vld [vmem:[%s4510_s2 + $0xe30] sm:$0xff] }
  0xe7   :  { %2588 = vmatpush3.msra.mxu0 %v432_v31  ;;  %2623 = vmatpush3.msra.mxu1 %v464_v32  ;;  %v530_v30 = vld [vmem:[%s4510_s2 + $0xf30] sm:$0xff]  ;;  %v513_v31 = vld [vmem:[%s4510_s2 + $0xea8] sm:$0xff] }
  0xe8   :  { %2589 = vmatprep.subr.mxu0 %v447_v33  ;;  %2624 = vmatprep.subr.mxu1 %v479_v34  ;;  %v545_v32 = vld [vmem:[%s4510_s2 + $0xfa8] sm:$0xff]  ;;  %v43_v33 = vld [vmem:[%s4508_s0 + $0x38] sm:$0xff] }
  0xe9   :  { %2590 = vmatpush3.msra.mxu0 %v431_v36  ;;  %2625 = vmatpush3.msra.mxu1 %v463_v37  ;;  %v497_v34 = vld [vmem:[%s4510_s2 + $0xe28] sm:$0xff]  ;;  %v512_v36 = vld [vmem:[%s4510_s2 + $0xea0] sm:$0xff] }
  0xea   :  { %2591 = vmatprep.subr.mxu0 %v446_v38  ;;  %2626 = vmatprep.subr.mxu1 %v478_v39  ;;  %v544_v37 = vld [vmem:[%s4510_s2 + $0xfa0] sm:$0xff] }
  0xeb   :  { %2592 = vmatpush3.msra.mxu0 %v430_v41  ;;  %2627 = vmatpush3.msra.mxu1 %v462_v42  ;;  %v496_v38 = vld [vmem:[%s4510_s2 + $0xe20] sm:$0xff]  ;;  %v511_v41 = vld [vmem:[%s4510_s2 + $0xe98] sm:$0xff] }
  0xec   :  { %2593 = vmatprep.subr.mxu0 %v445_v43  ;;  %2628 = vmatprep.subr.mxu1 %v477_v44  ;;  %v528_v39 = vld [vmem:[%s4510_s2 + $0xf20] sm:$0xff]  ;;  %v543_v42 = vld [vmem:[%s4510_s2 + $0xf98] sm:$0xff] }
  0xed   :  { %2594 = vmatpush3.msra.mxu0 %v429_v46  ;;  %2629 = vmatpush3.msra.mxu1 %v461_v47  ;;  %v495_v43 = vld [vmem:[%s4510_s2 + $0xe18] sm:$0xff]  ;;  %v542_v46 = vld [vmem:[%s4510_s2 + $0xf90] sm:$0xff]  ;;  %v697_v47 = vrot.slane %v43_v33, %v2989_v51 }
  0xee   :  { %2595 = vmatprep.subr.mxu0 %v444_v48  ;;  %2630 = vmatprep.subr.mxu1 %v476_v49  ;;  %v527_v44 = vld [vmem:[%s4510_s2 + $0xf18] sm:$0xff]  ;;  %v494_v48 = vld [vmem:[%s4510_s2 + $0xe10] sm:$0xff] }
  0xef   :  { %2596 = vmatpush3.msra.mxu0 %v428_v52  ;;  %1643 = vmatprep.mubr.f32.mxu0 %v688_v50  ;;  %v526_v49 = vld [vmem:[%s4510_s2 + $0xf10] sm:$0xff]  ;;  %v509_v52 = vld [vmem:[%s4510_s2 + $0xe88] sm:$0xff] }
  0xf0   :  { %2631 = vmatpush3.msra.mxu1 %v460_v53  ;;  %1644 = vmatmul.mubr.f32.vlgmr.msra.gmra.mxu0 %v680_v40  ;;  %v690_v40 = vcombine.high %v43_v33, %v43_v33  ;;  %v541_v53 = vld [vmem:[%s4510_s2 + $0xf88] sm:$0xff] }
  0xf1   :  { %1713 = vmatprep.mubr.f32.mxu1 %v689_v54  ;;  %2635 = vmatprep.subr.mxu0 %v523_v55  ;;  %v493_v54 = vld [vmem:[%s4510_s2 + $0xe08] sm:$0xff]  ;;  %v508_v55 = vld [vmem:[%s4510_s2 + $0xe80] sm:$0xff] }
  0xf2   :  { %2670 = vmatprep.subr.mxu1 %v555_v56  ;;  %1714 = vmatmul.mubr.f32.vlgmr.msra.gmra.mxu1 %v687_v45  ;;  %v510_v45 = vld [vmem:[%s4510_s2 + $0xe90] sm:$0xff]  ;;  %v704_v50 = vrot.slane %v690_v40, %v2989_v51  ;;  %v525_v51 = vld [vmem:[%s4510_s2 + $0xf08] sm:$0xff]  ;;  %v540_v56 = vld [vmem:[%s4510_s2 + $0xf80] sm:$0xff] }
  0xf3   :  { %2636 = vmatpush3.msra.mxu0 %v507_v57  ;;  %2671 = vmatpush3.msra.mxu1 %v539_v58  ;;  %v705_v57 = vcombine.high %v697_v47, %v697_v47  ;;  %v492_v58 = vld [vmem:[%s4510_s2 + $0xe00] sm:$0xff] }
  0xf4   :  { %2637 = vmatprep.subr.mxu0 %v522_v59  ;;  %2672 = vmatprep.subr.mxu1 %v554_v60  ;;  %v706_v59 = vcombine.high %v704_v50, %v704_v50  ;;  %v524_v60 = vld [vmem:[%s4510_s2 + $0xf00] sm:$0xff] }
  0xf5   :  { %2638 = vmatpush3.msra.mxu0 %v506_v61  ;;  %2673 = vmatpush3.msra.mxu1 %v538_v62  ;;  %v1859_v61 = vld [vmem:[%s4509_s1] sm:$0x3]  ;;  %v2793_v62 = vmov 0.0  }
  0xf6   :  { %2639 = vmatprep.subr.mxu0 %v521_v63  ;;  %2674 = vmatprep.subr.mxu1 %v553_v0  ;;  %v1870_v63 = vld [vmem:[%s4512_s4 + $0x20] sm:$0xff]  ;;  %v1869_v0 = vld [vmem:[%s4512_s4 + $0x18] sm:$0xff] }
  0xf7   :  { %2640 = vmatpush3.msra.mxu0 %v505_v1  ;;  %2675 = vmatpush3.msra.mxu1 %v537_v2  ;;  %v1868_v1 = vld [vmem:[%s4512_s4 + $0x10] sm:$0xff]  ;;  %v1867_v2 = vld [vmem:[%s4512_s4 + $0x8] sm:$0xff] }
  0xf8   :  { %2641 = vmatprep.subr.mxu0 %v520_v3  ;;  %2676 = vmatprep.subr.mxu1 %v552_v4  ;;  %v1866_v3 = vld [vmem:[%s4512_s4] sm:$0xff]  ;;  %v1956_v4 = vld [vmem:[%s4514_s6 + $0x18] sm:$0xff] }
  0xf9   :  { %2642 = vmatpush3.msra.mxu0 %v504_v5  ;;  %2677 = vmatpush3.msra.mxu1 %v536_v6  ;;  %v2177_v5 = vpop.f32.mrf.mxu0  ;;  %v2212_v6 = vpop.f32.mrf.mxu1 }
  0xfa   :  { %2643 = vmatprep.subr.mxu0 %v519_v7  ;;  %2678 = vmatprep.subr.mxu1 %v551_v8 }
  0xfb   :  { %2644 = vmatpush3.msra.mxu0 %v503_v9  ;;  %2679 = vmatpush3.msra.mxu1 %v535_v10  ;;  %v2178_v7 = vpop.f32.mrf.mxu0  ;;  %v2138_v10 = vld [vmem:[%s4511_s3] ss:$0 sm:$0xff] }
  0xfc   :  { %2645 = vmatprep.subr.mxu0 %v518_v11  ;;  %2680 = vmatprep.subr.mxu1 %v550_v12  ;;  %v2179_v9 = vadd.f32 %v2178_v7, %v2177_v5  ;;  %v2213_v11 = vpop.f32.mrf.mxu1 }
  0xfd   :  { %2646 = vmatpush3.msra.mxu0 %v502_v13  ;;  %2681 = vmatpush3.msra.mxu1 %v534_v14 }
  0xfe   :  { %2647 = vmatprep.subr.mxu0 %v517_v15  ;;  %2682 = vmatprep.subr.mxu1 %v549_v16  ;;  %v806_v14 = vadd.f32 %v2179_v9, %v2138_v10  ;;  %v2214_v15 = vadd.f32 %v2213_v11, %v2212_v6  ;;  %v1955_v9 = vld [vmem:[%s4514_s6 + $0x10] sm:$0xff]  ;;  %v1954_v10 = vld [vmem:[%s4514_s6 + $0x8] sm:$0xff]  ;;  %v1953_v11 = vld [vmem:[%s4514_s6] sm:$0xff] }
  0xff   :  { %2648 = vmatpush3.msra.mxu0 %v501_v17  ;;  %2683 = vmatpush3.msra.mxu1 %v533_v18 }
 0x100   :  { %2649 = vmatprep.subr.mxu0 %v516_v19  ;;  %2684 = vmatprep.subr.mxu1 %v548_v20  ;;  %v876_v19 = vadd.f32 %v2214_v15, %v806_v14 }
 0x101   :  { %2650 = vmatpush3.msra.mxu0 %v500_v21  ;;  %2685 = vmatpush3.msra.mxu1 %v532_v22 }
 0x102   :  { %2651 = vmatprep.subr.mxu0 %v515_v23  ;;  %2686 = vmatprep.subr.mxu1 %v547_v24 }
 0x103   :  { %2652 = vmatpush3.msra.mxu0 %v499_v25  ;;  %2687 = vmatpush3.msra.mxu1 %v531_v26 }
 0x104   :  { %2653 = vmatprep.subr.mxu0 %v514_v27  ;;  %2688 = vmatprep.subr.mxu1 %v546_v28 }
 0x105   :  { %2654 = vmatpush3.msra.mxu0 %v498_v29  ;;  %2689 = vmatpush3.msra.mxu1 %v530_v30 }
 0x106   :  { %2655 = vmatprep.subr.mxu0 %v513_v31  ;;  %2690 = vmatprep.subr.mxu1 %v545_v32  ;;  %v2247_v8 = vpop.f32.mrf.mxu0 }
 0x107   :  { %2656 = vmatpush3.msra.mxu0 %v497_v34  ;;  %2691 = vmatpush3.msra.mxu1 %v529_v35 }
 0x108   :  { %2657 = vmatprep.subr.mxu0 %v512_v36  ;;  %2692 = vmatprep.subr.mxu1 %v544_v37  ;;  %v2282_v12 = vpop.f32.mrf.mxu1  ;;  %v2248_v13 = vpop.f32.mrf.mxu0 }
 0x109   :  { %2658 = vmatpush3.msra.mxu0 %v496_v38  ;;  %2693 = vmatpush3.msra.mxu1 %v528_v39  ;;  %v2249_v17 = vadd.f32 %v2248_v13, %v2247_v8 }
 0x10a   :  { %2659 = vmatprep.subr.mxu0 %v511_v41  ;;  %2694 = vmatprep.subr.mxu1 %v543_v42  ;;  %v2283_v18 = vpop.f32.mrf.mxu1 }
 0x10b   :  { %2660 = vmatpush3.msra.mxu0 %v495_v43  ;;  %2695 = vmatpush3.msra.mxu1 %v527_v44  ;;  %v946_v22 = vadd.f32 %v2249_v17, %v876_v19  ;;  %v2284_v23 = vadd.f32 %v2283_v18, %v2282_v12  ;;  %v2139_v12 = vld [vmem:[%s4513_s5] ss:$0 sm:$0xff]  ;;  %v2041_v17 = vld [vmem:[%s4516_s8 + $0x18] sm:$0xff]  ;;  %v2040_v18 = vld [vmem:[%s4516_s8 + $0x10] sm:$0xff] }
 0x10c   :  { %2661 = vmatprep.subr.mxu0 %v510_v45  ;;  %2696 = vmatprep.subr.mxu1 %v542_v46  ;;  %v2039_v19 = vld [vmem:[%s4516_s8 + $0x8] sm:$0xff] }
 0x10d   :  { %2662 = vmatpush3.msra.mxu0 %v494_v48  ;;  %2697 = vmatpush3.msra.mxu1 %v526_v49  ;;  %v1016_v27 = vadd.f32 %v2284_v23, %v946_v22 }
 0x10e   :  { %2663 = vmatprep.subr.mxu0 %v509_v52  ;;  %2698 = vmatprep.subr.mxu1 %v541_v53 }
 0x10f   :  { %2664 = vmatpush3.msra.mxu0 %v493_v54  ;;  %2699 = vmatpush3.msra.mxu1 %v525_v51 }
 0x110   :  { %2665 = vmatprep.subr.mxu0 %v508_v55  ;;  %2700 = vmatprep.subr.mxu1 %v540_v56 }
 0x111   :  { %2666 = vmatpush3.msra.mxu0 %v492_v58  ;;  %1783 = vmatprep.mubr.f32.mxu0 %v705_v57 }
 0x112   :  { %2701 = vmatpush3.msra.mxu1 %v524_v60  ;;  %1853 = vmatprep.mubr.f32.mxu1 %v706_v59 }
 0x113   :  { %1784 = vmatmul.mubr.f32.vlgmr.msra.gmra.mxu0 %v697_v47  ;;  %1854 = vmatmul.mubr.f32.vlgmr.msra.gmra.mxu1 %v704_v50 }
 0x114   :  { %1861 = vrot.lane.b32.xlu0 %v1859_v61, %s2792_s13  ;;  %2721 = vmatprep.subr.mxu0 %v2793_v62 }
 0x115   :  { %2734 = vmatprep.subr.mxu1 %v2793_v62  ;;  %2722 = vmatpush3.msra.mxu0 %v1870_v63 }
 0x116   :  { %2723 = vmatprep.subr.mxu0 %v2793_v62  ;;  %2731 = vmatprep.mubr.msk.f32.mxu0 %vm2794_vm0, %v2793_v62 }
 0x117   :  { %2724 = vmatpush3.msra.mxu0 %v1869_v0  ;;  %2742 = vmatprep.mubr.msk.f32.mxu1 %vm2794_vm0, %v2793_v62 }
 0x118   :  { %2725 = vmatprep.subr.mxu0 %v2793_v62  ;;  %2735 = vmatpush3.msra.mxu1 %v1956_v4 }
 0x119   :  { %2726 = vmatpush3.msra.mxu0 %v1868_v1  ;;  %2736 = vmatprep.subr.mxu1 %v2793_v62 }
 0x11a   :  { %2727 = vmatprep.subr.mxu0 %v2793_v62  ;;  %2737 = vmatpush3.msra.mxu1 %v1955_v9 }
 0x11b   :  { %2728 = vmatpush3.msra.mxu0 %v1867_v2  ;;  %2738 = vmatprep.subr.mxu1 %v2793_v62 }
 0x11c   :  { %2729 = vmatprep.subr.mxu0 %v2793_v62  ;;  %2739 = vmatpush3.msra.mxu1 %v1954_v10 }
 0x11d   :  { %2730 = vmatpush3.msra.mxu0 %v1866_v3  ;;  %2740 = vmatprep.subr.mxu1 %v2793_v62 }
 0x11e   :  { %2741 = vmatpush3.msra.mxu1 %v1953_v11 }
 0x11f   :  { %2745 = vmatprep.subr.mxu1 %v2793_v62 }
 0x128   :  { %v2317_v16 = vpop.f32.mrf.mxu0 }
 0x12a   :  { %v2352_v20 = vpop.f32.mrf.mxu1  ;;  %v2318_v21 = vpop.f32.mrf.mxu0 }
 0x12b   :  { %v2319_v25 = vadd.f32 %v2318_v21, %v2317_v16  ;;  %v2141_v21 = vld [vmem:[%s4515_s7] ss:$0 sm:$0xff] }
 0x12c   :  { %v2353_v26 = vpop.f32.mrf.mxu1 }
 0x12d   :  { %v1086_v30 = vadd.f32 %v2319_v25, %v1016_v27  ;;  %v2354_v31 = vadd.f32 %v2353_v26, %v2352_v20  ;;  %v2038_v20 = vld [vmem:[%s4516_s8] sm:$0xff]  ;;  %s2769_s8 = scalar_lea.vmem %s2131_s19, 32 }
 0x12e   :  { %v2143_v26 = vld [vmem:[%s4517_s9] ss:$0 sm:$0xff]  ;;  %p2770_p0 = scmp.ne.s32.totalorder %s2131_s19, %s2769_s8  ;;  %p2775_p2 = scmp.lt.s32.totalorder %s2769_s8, %s2769_s8 }
 0x12f   :  { %v1156_v35 = vadd.f32 %v2354_v31, %v1086_v30 }
 0x130   :  { %p2776_p3 = por %p2775_p2, %p2774_p1 }
 0x132   :  { %p2777_p4 = pnand %p2776_p3, %p2770_p0 }
 0x14a   :  { %v2387_v24 = vpop.f32.mrf.mxu0 }
 0x14c   :  { %v2422_v28 = vpop.f32.mrf.mxu1  ;;  %v2388_v29 = vpop.f32.mrf.mxu0 }
 0x14d   :  { %v2389_v33 = vadd.f32 %v2388_v29, %v2387_v24 }
 0x14e   :  { %v2423_v34 = vpop.f32.mrf.mxu1 }
 0x14f   :  { %v1226_v38 = vadd.f32 %v2389_v33, %v1156_v35  ;;  %v2424_v39 = vadd.f32 %v2423_v34, %v2422_v28 }
 0x151   :  { %v1296_v43 = vadd.f32 %v2424_v39, %v1226_v38 }
 0x16c   :  { %v2457_v32 = vpop.f32.mrf.mxu0 }
 0x16e   :  { %v2492_v36 = vpop.f32.mrf.mxu1  ;;  %v2458_v37 = vpop.f32.mrf.mxu0 }
 0x16f   :  { %v2459_v41 = vadd.f32 %v2458_v37, %v2457_v32 }
 0x170   :  { %v2493_v42 = vpop.f32.mrf.mxu1 }
 0x171   :  { %v1366_v46 = vadd.f32 %v2459_v41, %v1296_v43  ;;  %v2494_v47 = vadd.f32 %v2493_v42, %v2492_v36 }
 0x173   :  { %v1436_v52 = vadd.f32 %v2494_v47, %v1366_v46 }
 0x186   :  { %v1862_v6 = vpop.permute.xlu0 %1861 }
 0x18e   :  { %v2527_v40 = vpop.f32.mrf.mxu0 }
 0x190   :  { %v2562_v44 = vpop.f32.mrf.mxu1  ;;  %v2528_v45 = vpop.f32.mrf.mxu0 }
 0x191   :  { %v2529_v49 = vadd.f32 %v2528_v45, %v2527_v40 }
 0x192   :  { %v2563_v50 = vpop.f32.mrf.mxu1 }
 0x193   :  { %v1506_v51 = vadd.f32 %v2529_v49, %v1436_v52  ;;  %v2564_v55 = vadd.f32 %v2563_v50, %v2562_v44 }
 0x195   :  { %v1576_v58 = vadd.f32 %v2564_v55, %v1506_v51 }
 0x1b0   :  { %v2597_v48 = vpop.f32.mrf.mxu0 }
 0x1b2   :  { %v2632_v53 = vpop.f32.mrf.mxu1  ;;  %v2598_v54 = vpop.f32.mrf.mxu0 }
 0x1b3   :  { %v2599_v56 = vadd.f32 %v2598_v54, %v2597_v48 }
 0x1b4   :  { %v2633_v57 = vpop.f32.mrf.mxu1 }
 0x1b5   :  { %v1646_v59 = vadd.f32 %v2599_v56, %v1576_v58  ;;  %v2634_v60 = vadd.f32 %v2633_v57, %v2632_v53 }
 0x1b7   :  { %v1716_v2 = vadd.f32 %v2634_v60, %v1646_v59 }
 0x1d3   :  { %v2667_v61 = vpop.f32.mrf.mxu0  ;;  %v2702_v63 = vpop.f32.mrf.mxu1 }
 0x1d5   :  { %v2668_v0 = vpop.f32.mrf.mxu0  ;;  %v2703_v1 = vpop.f32.mrf.mxu1 }
 0x1d6   :  { %v2669_v3 = vadd.f32 %v2668_v0, %v2667_v61  ;;  %v2704_v5 = vadd.f32 %v2703_v1, %v2702_v63 }
 0x1d8   :  { %v1786_v4 = vadd.f32 %v2669_v3, %v1716_v2 }
 0x1da   :  { %v1856_v7 = vadd.f32 %v2704_v5, %v1786_v4 }
 0x1dc   :  { %v1865_v8 = vsel %vm1864_vm1, %v1856_v7, %v1862_v6 }
 0x1dd   :  { %2732 = vmatmul.mubr.msk.f32.vlgmr.msra.gmra.mxu0 %vm1878_vm2, %v1865_v8 }
 0x29d   :  { %v1948_v13 = vpop.f32.mrf.mxu0 }
 0x29e   :  { %v1949_v14 = vadd.f32 %v2139_v12, %v1948_v13 }
 0x29f   :  { %v2733_v15 = vpop.f32.mrf.mxu0 }
 0x2a0   :  { %v1952_v16 = vmax.f32 %v1949_v14, 0.0 }
 0x2a2   :  { %2743 = vmatmul.mubr.msk.f32.vlgmr.msra.gmra.mxu1 %vm1864_vm1, %v1952_v16 }
 0x2a3   :  { %2746 = vmatpush3.msra.mxu1 %v2041_v17  ;;  %2753 = vmatprep.mubr.msk.f32.mxu1 %vm2794_vm0, %v2793_v62 }
 0x2a4   :  { %2747 = vmatprep.subr.mxu1 %v2793_v62 }
 0x2a5   :  { %2748 = vmatpush3.msra.mxu1 %v2040_v18 }
 0x2a6   :  { %2749 = vmatprep.subr.mxu1 %v2793_v62 }
 0x2a7   :  { %2750 = vmatpush3.msra.mxu1 %v2039_v19 }
 0x2a8   :  { %2751 = vmatprep.subr.mxu1 %v2793_v62 }
 0x2a9   :  { %2752 = vmatpush3.msra.mxu1 %v2038_v20 }
 0x362   :  { %v2033_v22 = vpop.f32.mrf.mxu1 }
 0x363   :  { %v2034_v23 = vadd.f32 %v2141_v21, %v2033_v22 }
 0x364   :  { %v2744_v24 = vpop.f32.mrf.mxu1 }
 0x365   :  { %v2037_v25 = vmax.f32 %v2034_v23, 0.0 }
 0x367   :  { %2754 = vmatmul.mubr.msk.f32.vlgmr.msra.gmra.mxu1 %vm1864_vm1, %v2037_v25 }
 0x427   :  { %v2118_v62 = vpop.f32.mrf.mxu1 }
 0x428   :  { %v2119_v27 = vadd.f32 %v2143_v26, %v2118_v62 }
 0x429   :  { %v2755_v28 = vpop.f32.mrf.mxu1 }
 0x42a   :  { %2123 = vst.msk [vmem:[#allocation2] sm:$0x3] %vm2122_vm3, %v2119_v27 }
 0x42b   :  { %2780 = shalt.err (!%p2777_p4)
}
 0x42c   :  { %2133 = dma.vmem_to_hbm [thread:$0]  %s2131_s19, 32, %s4518_s10, [#allocation3]  }
 0x42d   :  { %2789 = dma.done.wait [#allocation3], 32  }
 0x42e   :  { %2790 = vsyncadd [#allocation3], 4294967264 }
 0x42f   :  { %2137 = vsyncpa [#allocation3], 1 }

</bundles_post_ra>
